<compile_context>
chip_gen: v7x
topology: tpu7x:2x2x1
jax: 0.10.0
libtpu: 0.0.40
codegen_flags: <defaults>
</compile_context>

<pallas_src>
import jax
import jax.numpy as jnp
import numpy as np
from jax.experimental import pallas as pl
from jax.experimental.pallas import tpu as pltpu

# ---- problem sizes (small, consistent with the module) ----
B = 2                       # batch
C = 32                      # channels
NUM_HEADS = 8
HEAD_DIM = C // NUM_HEADS   # 4
L = 16                      # sequence length
GROUPS = 8                  # GroupNorm(8, channels)
CG = C // GROUPS            # channels per group
EPS = 1e-5
HL = NUM_HEADS * L          # 128

# --------------------------------------------------------------------------
# Constant selection / mask matrices, built once on the host (numpy) and
# passed to the kernel as ordinary f32 VMEM inputs (perf-review item 2).
# --------------------------------------------------------------------------
_c = np.arange(C)
# Group pooling: stats[r, q] = mean over group(r) of column q of the sums slab.
GN_POOL = ((_c[:, None] // CG) == (_c[None, :] // CG)).astype(np.float32) / float(CG * L)

_jc = np.arange(B * L)       # columns of q_all  (batch-major, position-minor)
_m = np.arange(B * HL)       # columns of q_exp_big (batch, head, position)
# TILE_BIG[jc, m] = 1 iff column jc of q_all feeds column m of the expansion
TILE_BIG = (((_jc[:, None] // L) == (_m[None, :] // HL)) &
            ((_jc[:, None] % L) == (_m[None, :] % L))).astype(np.float32)      # (B*L, B*HL)
# HEAD_MASK2[ch, m] = 1 iff channel ch belongs to the head of column m
HEAD_MASK2 = ((_c[:, None] // HEAD_DIM) ==
              ((_m[None, :] % HL) // L)).astype(np.float32)                    # (C, B*HL)
_i = np.arange(B * L)
# COLLAPSE[m, i]: picks, for output column i (=batch*L+pos), the matching
# (batch, *, pos) columns of the head-expanded attention output.
COLLAPSE = (((_m[:, None] // HL) == (_i[None, :] // L)) &
            ((_m[:, None] % L) == (_i[None, :] % L))).astype(np.float32)       # (B*HL, B*L)


def attn_block_kernel(x_ref, gamma_ref, beta_ref, wqkv_ref, bqkv_ref,
                      wproj_ref, bproj_ref, gn_pool_ref, tile_ref,
                      hmask_ref, collapse_ref, y_ref, attn_ref):
    f32 = jnp.float32
    gamma = gamma_ref[...]                     # (C, 1)
    beta = beta_ref[...]                       # (C, 1)
    xs = [x_ref[b] for b in range(B)]          # each (C, L)

    # ---------------- GroupNorm statistics: ONE fused MXU matmul -------------
    sum_cols = []
    for xb in xs:
        sum_cols.append(jnp.sum(xb, axis=1, keepdims=True))          # (C, 1)
        sum_cols.append(jnp.sum(xb * xb, axis=1, keepdims=True))     # (C, 1)
    sums = jnp.concatenate(sum_cols, axis=1)                         # (C, 2B)
    stats = jnp.dot(gn_pool_ref[...], sums,
                    preferred_element_type=f32)                      # (C, 2B)

    def normalize(xb, col):
        mean = stats[:, col:col + 1]                                 # (C, 1)
        ex2 = stats[:, col + 1:col + 2]                              # (C, 1)
        # TODO(synk): single-pass E[x^2]-mean^2 (clamped); switch to a two-pass
        # variance if |mean| >> std ever holds for real data.
        var = jnp.maximum(ex2 - mean * mean, 0.0)
        scale = gamma * jax.lax.rsqrt(var + EPS)
        shift = beta - mean * scale
        return xb * scale + shift                                    # (C, L)

    # Batch items concatenated along lanes -> single QKV / proj matmuls.
    h_all = jnp.concatenate([normalize(xs[b], 2 * b) for b in range(B)],
                            axis=1)                                  # (C, B*L)

    # ---------------- fused QKV (one matmul for the whole batch) -------------
    qkv_all = jnp.dot(wqkv_ref[...], h_all,
                      preferred_element_type=f32) + bqkv_ref[...]    # (3C, B*L)
    q_all = qkv_all[0:C] * (HEAD_DIM ** -0.5)                        # (C, B*L)
    k_all = qkv_all[C:2 * C]                                         # (C, B*L)
    v_all = qkv_all[2 * C:3 * C]                                     # (C, B*L)

    # ------- head-expanded Q for both batch items: ONE 256-lane matmul -------
    hmask = hmask_ref[...]                                           # (C, B*HL)
    q_exp_big = jnp.dot(q_all, tile_ref[...],
                        preferred_element_type=f32) * hmask          # (C, B*HL)

    out_exp = []
    for b in range(B):
        q_exp_b = q_exp_big[:, b * HL:(b + 1) * HL]                  # (C, HL) clean 128-lane slice
        k_b = k_all[:, b * L:(b + 1) * L]                            # (C, L)
        v_b = v_all[:, b * L:(b + 1) * L]                            # (C, L)

        # logits[h*L+i, j] = scale * <q_h[:, i], k_h[:, j]>  (contract channels, no .T)
        logits = jax.lax.dot_general(q_exp_b, k_b,
                                     (((0,), (0,)), ((), ())),
                                     preferred_element_type=f32)     # (HL, L)
        # Exact per-(head, query) softmax: each row is one head's logit row.
        m_b = jnp.max(logits, axis=-1, keepdims=True)                # (HL, 1)
        e_b = jnp.exp(logits - m_b)                                  # (HL, L)
        d_b = jnp.sum(e_b, axis=-1, keepdims=True)                   # (HL, 1), >= 1
        p_b = e_b / d_b                                              # exact normalization
        attn_ref[b] = p_b                                            # (HL, L): reshape-free (H, L, L)

        # out_exp[c, h*L+i] = sum_j v[c, j] * p[h*L+i, j]  (contract lanes, no .T)
        out_exp.append(jax.lax.dot_general(v_b, p_b,
                                           (((1,), (1,)), ((), ())),
                                           preferred_element_type=f32))  # (C, HL)

    # ------- collapse heads (one matmul) + fused projection + residual -------
    out_big = jnp.concatenate(out_exp, axis=1) * hmask               # (C, B*HL)
    out_all = jnp.dot(out_big, collapse_ref[...],
                      preferred_element_type=f32)                    # (C, B*L)
    y_all = jnp.dot(wproj_ref[...], out_all,
                    preferred_element_type=f32) + bproj_ref[...]     # (C, B*L)
    for b in range(B):
        y_ref[b] = xs[b] + y_all[:, b * L:(b + 1) * L]


@jax.jit
def attention_block_1d(x, gamma, beta, wqkv, bqkv, wproj, bproj):
    """x: (B, C, L) f32. Returns (x + attn_out, attn) like the PyTorch module."""
    consts = (jnp.asarray(GN_POOL), jnp.asarray(TILE_BIG),
              jnp.asarray(HEAD_MASK2), jnp.asarray(COLLAPSE))
    grid_spec = pltpu.PrefetchScalarGridSpec(
        num_scalar_prefetch=0,
        grid=(1,),                                   # whole problem = one step
        in_specs=[
            pl.BlockSpec((B, C, L), lambda i: (0, 0, 0)),      # x
            pl.BlockSpec((C, 1), lambda i: (0, 0)),            # gamma
            pl.BlockSpec((C, 1), lambda i: (0, 0)),            # beta
            pl.BlockSpec((3 * C, C), lambda i: (0, 0)),        # W_qkv
            pl.BlockSpec((3 * C, 1), lambda i: (0, 0)),        # b_qkv
            pl.BlockSpec((C, C), lambda i: (0, 0)),            # W_proj
            pl.BlockSpec((C, 1), lambda i: (0, 0)),            # b_proj
            pl.BlockSpec((C, C), lambda i: (0, 0)),            # GN_POOL
            pl.BlockSpec((B * L, B * HL), lambda i: (0, 0)),   # TILE_BIG
            pl.BlockSpec((C, B * HL), lambda i: (0, 0)),       # HEAD_MASK2
            pl.BlockSpec((B * HL, B * L), lambda i: (0, 0)),   # COLLAPSE
        ],
        out_specs=[
            pl.BlockSpec((B, C, L), lambda i: (0, 0, 0)),      # y
            pl.BlockSpec((B, HL, L), lambda i: (0, 0, 0)),     # attn, heads on sublanes
        ],
    )
    y, attn_raw = pl.pallas_call(
        attn_block_kernel,
        grid_spec=grid_spec,
        out_shape=(
            jax.ShapeDtypeStruct((B, C, L), jnp.float32),
            jax.ShapeDtypeStruct((B, HL, L), jnp.float32),
        ),
        compiler_params=pltpu.CompilerParams(
            dimension_semantics=("arbitrary",)),
    )(x, gamma, beta, wqkv, bqkv, wproj, bproj, *consts)
    # (B, H*L, L) -> (B, H, L, L): pure split of a leading dim (layout-free,
    # no transpose / no extra data-moving dispatch).
    attn = attn_raw.reshape(B, NUM_HEADS, L, L)
    return y, attn


def reference_forward(x, gamma, beta, wqkv, bqkv, wproj, bproj):
    """Pure-JAX replica of the PyTorch forward (for correctness check)."""
    batch, channels, length = x.shape
    hp = jax.lax.Precision.HIGHEST
    xg = x.reshape(batch, GROUPS, CG * length)
    mean = xg.mean(axis=-1, keepdims=True)
    var = ((xg - mean) ** 2).mean(axis=-1, keepdims=True)
    h = (xg - mean) / jnp.sqrt(var + EPS)
    h = h.reshape(batch, channels, length)
    h = h * gamma.reshape(1, channels, 1) + beta.reshape(1, channels, 1)

    qkv = jnp.einsum('oc,bcl->bol', wqkv, h, precision=hp) + bqkv.reshape(1, -1, 1)
    qkv = qkv.reshape(batch, 3, NUM_HEADS, HEAD_DIM, length)
    q, k, v = qkv[:, 0], qkv[:, 1], qkv[:, 2]
    q = jnp.swapaxes(q, -2, -1)
    k = jnp.swapaxes(k, -2, -1)
    v = jnp.swapaxes(v, -2, -1)
    attn = jnp.einsum('bhld,bhmd->bhlm', q, k, precision=hp) * (HEAD_DIM ** -0.5)
    attn = jax.nn.softmax(attn, axis=-1)
    out = jnp.einsum('bhlm,bhmd->bhld', attn, v, precision=hp)
    out = jnp.swapaxes(out, -2, -1).reshape(batch, channels, length)
    out = jnp.einsum('oc,bcl->bol', wproj, out, precision=hp) + bproj.reshape(1, -1, 1)
    return x + out, attn


if __name__ == "__main__":
    key = jax.random.PRNGKey(0)
    kx, kw1, kb1, kw2, kb2, kg, kb = jax.random.split(key, 7)

    x = jax.random.normal(kx, (B, C, L), dtype=jnp.float32)

    # Deterministic parameter init (shapes from the module's __init__).
    gamma = 1.0 + 0.05 * jax.random.normal(kg, (C, 1), dtype=jnp.float32)
    beta = 0.05 * jax.random.normal(kb, (C, 1), dtype=jnp.float32)
    wqkv = 0.1 * jax.random.normal(kw1, (3 * C, C), dtype=jnp.float32)   # Conv1d k=1
    bqkv = 0.1 * jax.random.normal(kb1, (3 * C, 1), dtype=jnp.float32)
    wproj = 0.1 * jax.random.normal(kw2, (C, C), dtype=jnp.float32)
    bproj = 0.1 * jax.random.normal(kb2, (C, 1), dtype=jnp.float32)

    y, attn = attention_block_1d(x, gamma, beta, wqkv, bqkv, wproj, bproj)
    jax.block_until_ready((y, attn))

    y_ref, attn_ref = reference_forward(x, gamma, beta, wqkv, bqkv, wproj, bproj)
    # Conservative tolerance for MXU f32 rounding; softmax itself is exact now.
    np.testing.assert_allclose(np.asarray(y), np.asarray(y_ref), atol=2e-3, rtol=2e-3)
    np.testing.assert_allclose(np.asarray(attn), np.asarray(attn_ref), atol=2e-3, rtol=2e-3)

    print("KERNEL_OK")
</pallas_src>

<mosaic_0001>
module attributes {stable_mosaic.version = 11 : i64} {
  func.func @attn_block_kernel(%arg0: i32, %arg1: memref<2x32x16xf32, #tpu.memory_space<vmem>>, %arg2: memref<32x1xf32, #tpu.memory_space<vmem>>, %arg3: memref<32x1xf32, #tpu.memory_space<vmem>>, %arg4: memref<96x32xf32, #tpu.memory_space<vmem>>, %arg5: memref<96x1xf32, #tpu.memory_space<vmem>>, %arg6: memref<32x32xf32, #tpu.memory_space<vmem>>, %arg7: memref<32x1xf32, #tpu.memory_space<vmem>>, %arg8: memref<32x32xf32, #tpu.memory_space<vmem>>, %arg9: memref<32x256xf32, #tpu.memory_space<vmem>>, %arg10: memref<32x256xf32, #tpu.memory_space<vmem>>, %arg11: memref<256x32xf32, #tpu.memory_space<vmem>>, %arg12: memref<2x32x16xf32, #tpu.memory_space<vmem>>, %arg13: memref<2x128x16xf32, #tpu.memory_space<vmem>>) attributes {dimension_semantics = [#tpu.dimension_semantics<arbitrary>], iteration_bounds = array<i64: 1>, scalar_prefetch = 0 : i64, scratch_operands = 0 : i64, tpu.core_type = #tpu.core_type<tc>, window_params = [{pipeline_mode = #tpu.pipeline_mode<synchronous>, transform_indices = @transform_0, window_bounds = array<i64: 2, 32, 16>}, {pipeline_mode = #tpu.pipeline_mode<synchronous>, transform_indices = @transform_1, window_bounds = array<i64: 32, 1>}, {pipeline_mode = #tpu.pipeline_mode<synchronous>, transform_indices = @transform_2, window_bounds = array<i64: 32, 1>}, {pipeline_mode = #tpu.pipeline_mode<synchronous>, transform_indices = @transform_3, window_bounds = array<i64: 96, 32>}, {pipeline_mode = #tpu.pipeline_mode<synchronous>, transform_indices = @transform_4, window_bounds = array<i64: 96, 1>}, {pipeline_mode = #tpu.pipeline_mode<synchronous>, transform_indices = @transform_5, window_bounds = array<i64: 32, 32>}, {pipeline_mode = #tpu.pipeline_mode<synchronous>, transform_indices = @transform_6, window_bounds = array<i64: 32, 1>}, {pipeline_mode = #tpu.pipeline_mode<synchronous>, transform_indices = @transform_7, window_bounds = array<i64: 32, 32>}, {pipeline_mode = #tpu.pipeline_mode<synchronous>, transform_indices = @transform_8, window_bounds = array<i64: 32, 256>}, {pipeline_mode = #tpu.pipeline_mode<synchronous>, transform_indices = @transform_9, window_bounds = array<i64: 32, 256>}, {pipeline_mode = #tpu.pipeline_mode<synchronous>, transform_indices = @transform_10, window_bounds = array<i64: 256, 32>}, {pipeline_mode = #tpu.pipeline_mode<synchronous>, transform_indices = @transform_11, window_bounds = array<i64: 2, 32, 16>}, {pipeline_mode = #tpu.pipeline_mode<synchronous>, transform_indices = @transform_12, window_bounds = array<i64: 2, 128, 16>}]} {
    %c0 = arith.constant 0 : index
    %c0_0 = arith.constant 0 : index
    %0 = vector.load %arg2[%c0, %c0_0] : memref<32x1xf32, #tpu.memory_space<vmem>>, vector<32x1xf32>
    %c0_1 = arith.constant 0 : index
    %c0_2 = arith.constant 0 : index
    %1 = vector.load %arg3[%c0_1, %c0_2] : memref<32x1xf32, #tpu.memory_space<vmem>>, vector<32x1xf32>
    %c0_3 = arith.constant 0 : index
    %c0_4 = arith.constant 0 : index
    %c0_5 = arith.constant 0 : index
    %2 = vector.load %arg1[%c0_3, %c0_4, %c0_5] : memref<2x32x16xf32, #tpu.memory_space<vmem>>, vector<1x32x16xf32>
    %3 = vector.shape_cast %2 : vector<1x32x16xf32> to vector<32x16xf32>
    %c1 = arith.constant 1 : index
    %c0_6 = arith.constant 0 : index
    %c0_7 = arith.constant 0 : index
    %4 = vector.load %arg1[%c1, %c0_6, %c0_7] : memref<2x32x16xf32, #tpu.memory_space<vmem>>, vector<1x32x16xf32>
    %5 = vector.shape_cast %4 : vector<1x32x16xf32> to vector<32x16xf32>
    %cst = arith.constant dense<0.000000e+00> : vector<32xf32>
    %6 = vector.multi_reduction <add>, %3, %cst [1] : vector<32x16xf32> to vector<32xf32>
    %7 = vector.shape_cast %6 : vector<32xf32> to vector<32x1xf32>
    %8 = arith.mulf %3, %3 : vector<32x16xf32>
    %cst_8 = arith.constant dense<0.000000e+00> : vector<32xf32>
    %9 = vector.multi_reduction <add>, %8, %cst_8 [1] : vector<32x16xf32> to vector<32xf32>
    %10 = vector.shape_cast %9 : vector<32xf32> to vector<32x1xf32>
    %cst_9 = arith.constant dense<0.000000e+00> : vector<32xf32>
    %11 = vector.multi_reduction <add>, %5, %cst_9 [1] : vector<32x16xf32> to vector<32xf32>
    %12 = vector.shape_cast %11 : vector<32xf32> to vector<32x1xf32>
    %13 = arith.mulf %5, %5 : vector<32x16xf32>
    %cst_10 = arith.constant dense<0.000000e+00> : vector<32xf32>
    %14 = vector.multi_reduction <add>, %13, %cst_10 [1] : vector<32x16xf32> to vector<32xf32>
    %15 = vector.shape_cast %14 : vector<32xf32> to vector<32x1xf32>
    %16 = tpu.concatenate %7, %10, %12, %15 in 1 : vector<32x1xf32>, vector<32x1xf32>, vector<32x1xf32>, vector<32x1xf32> -> vector<32x4xf32>
    %c0_11 = arith.constant 0 : index
    %c0_12 = arith.constant 0 : index
    %17 = vector.load %arg8[%c0_11, %c0_12] : memref<32x32xf32, #tpu.memory_space<vmem>>, vector<32x32xf32>
    %cst_13 = arith.constant dense<0.000000e+00> : vector<32x4xf32>
    %18 = tpu.matmul %17, %16, %cst_13 {dimension_numbers = #tpu.dot_dimension_numbers<[1], [0], [0], [1], [0, 0, 1, 1], [], []>} : vector<32x32xf32>, vector<32x4xf32>, vector<32x4xf32> -> vector<32x4xf32>
    %19 = vector.extract_strided_slice %18 {offsets = [0, 0], sizes = [32, 1], strides = [1, 1]} : vector<32x4xf32> to vector<32x1xf32>
    %20 = vector.extract_strided_slice %18 {offsets = [0, 1], sizes = [32, 1], strides = [1, 1]} : vector<32x4xf32> to vector<32x1xf32>
    %21 = arith.mulf %19, %19 : vector<32x1xf32>
    %22 = arith.subf %20, %21 : vector<32x1xf32>
    %cst_14 = arith.constant 0.000000e+00 : f32
    %23 = vector.broadcast %cst_14 : f32 to vector<32x1xf32>
    %24 = arith.maximumf %22, %23 : vector<32x1xf32>
    %cst_15 = arith.constant 9.99999974E-6 : f32
    %25 = vector.broadcast %cst_15 : f32 to vector<32x1xf32>
    %26 = arith.addf %24, %25 : vector<32x1xf32>
    %27 = math.rsqrt %26 : vector<32x1xf32>
    %28 = arith.mulf %0, %27 : vector<32x1xf32>
    %29 = arith.mulf %19, %28 : vector<32x1xf32>
    %30 = arith.subf %1, %29 : vector<32x1xf32>
    %31 = vector.broadcast %28 : vector<32x1xf32> to vector<32x16xf32>
    %32 = arith.mulf %3, %31 : vector<32x16xf32>
    %33 = vector.broadcast %30 : vector<32x1xf32> to vector<32x16xf32>
    %34 = arith.addf %32, %33 : vector<32x16xf32>
    %35 = vector.extract_strided_slice %18 {offsets = [0, 2], sizes = [32, 1], strides = [1, 1]} : vector<32x4xf32> to vector<32x1xf32>
    %36 = vector.extract_strided_slice %18 {offsets = [0, 3], sizes = [32, 1], strides = [1, 1]} : vector<32x4xf32> to vector<32x1xf32>
    %37 = arith.mulf %35, %35 : vector<32x1xf32>
    %38 = arith.subf %36, %37 : vector<32x1xf32>
    %cst_16 = arith.constant 0.000000e+00 : f32
    %39 = vector.broadcast %cst_16 : f32 to vector<32x1xf32>
    %40 = arith.maximumf %38, %39 : vector<32x1xf32>
    %cst_17 = arith.constant 9.99999974E-6 : f32
    %41 = vector.broadcast %cst_17 : f32 to vector<32x1xf32>
    %42 = arith.addf %40, %41 : vector<32x1xf32>
    %43 = math.rsqrt %42 : vector<32x1xf32>
    %44 = arith.mulf %0, %43 : vector<32x1xf32>
    %45 = arith.mulf %35, %44 : vector<32x1xf32>
    %46 = arith.subf %1, %45 : vector<32x1xf32>
    %47 = vector.broadcast %44 : vector<32x1xf32> to vector<32x16xf32>
    %48 = arith.mulf %5, %47 : vector<32x16xf32>
    %49 = vector.broadcast %46 : vector<32x1xf32> to vector<32x16xf32>
    %50 = arith.addf %48, %49 : vector<32x16xf32>
    %51 = tpu.concatenate %34, %50 in 1 : vector<32x16xf32>, vector<32x16xf32> -> vector<32x32xf32>
    %c0_18 = arith.constant 0 : index
    %c0_19 = arith.constant 0 : index
    %52 = vector.load %arg4[%c0_18, %c0_19] : memref<96x32xf32, #tpu.memory_space<vmem>>, vector<96x32xf32>
    %cst_20 = arith.constant dense<0.000000e+00> : vector<96x32xf32>
    %53 = tpu.matmul %52, %51, %cst_20 {dimension_numbers = #tpu.dot_dimension_numbers<[1], [0], [0], [1], [0, 0, 1, 1], [], []>} : vector<96x32xf32>, vector<32x32xf32>, vector<96x32xf32> -> vector<96x32xf32>
    %c0_21 = arith.constant 0 : index
    %c0_22 = arith.constant 0 : index
    %54 = vector.load %arg5[%c0_21, %c0_22] : memref<96x1xf32, #tpu.memory_space<vmem>>, vector<96x1xf32>
    %55 = vector.broadcast %54 : vector<96x1xf32> to vector<96x32xf32>
    %56 = arith.addf %53, %55 : vector<96x32xf32>
    %57 = vector.extract_strided_slice %56 {offsets = [0, 0], sizes = [32, 32], strides = [1, 1]} : vector<96x32xf32> to vector<32x32xf32>
    %cst_23 = arith.constant 5.000000e-01 : f32
    %58 = vector.broadcast %cst_23 : f32 to vector<32x32xf32>
    %59 = arith.mulf %57, %58 : vector<32x32xf32>
    %60 = vector.extract_strided_slice %56 {offsets = [32, 0], sizes = [32, 32], strides = [1, 1]} : vector<96x32xf32> to vector<32x32xf32>
    %61 = vector.extract_strided_slice %56 {offsets = [64, 0], sizes = [32, 32], strides = [1, 1]} : vector<96x32xf32> to vector<32x32xf32>
    %c0_24 = arith.constant 0 : index
    %c0_25 = arith.constant 0 : index
    %62 = vector.load %arg10[%c0_24, %c0_25] : memref<32x256xf32, #tpu.memory_space<vmem>>, vector<32x256xf32>
    %c0_26 = arith.constant 0 : index
    %c0_27 = arith.constant 0 : index
    %63 = vector.load %arg9[%c0_26, %c0_27] : memref<32x256xf32, #tpu.memory_space<vmem>>, vector<32x256xf32>
    %cst_28 = arith.constant dense<0.000000e+00> : vector<32x256xf32>
    %64 = tpu.matmul %59, %63, %cst_28 {dimension_numbers = #tpu.dot_dimension_numbers<[1], [0], [0], [1], [0, 0, 1, 1], [], []>} : vector<32x32xf32>, vector<32x256xf32>, vector<32x256xf32> -> vector<32x256xf32>
    %65 = arith.mulf %64, %62 : vector<32x256xf32>
    %66 = vector.extract_strided_slice %65 {offsets = [0, 0], sizes = [32, 128], strides = [1, 1]} : vector<32x256xf32> to vector<32x128xf32>
    %67 = vector.extract_strided_slice %60 {offsets = [0, 0], sizes = [32, 16], strides = [1, 1]} : vector<32x32xf32> to vector<32x16xf32>
    %68 = vector.extract_strided_slice %61 {offsets = [0, 0], sizes = [32, 16], strides = [1, 1]} : vector<32x32xf32> to vector<32x16xf32>
    %cst_29 = arith.constant dense<0.000000e+00> : vector<128x16xf32>
    %69 = tpu.matmul %66, %67, %cst_29 {dimension_numbers = #tpu.dot_dimension_numbers<[0], [0], [1], [1], [0, 1, 1, 1], [], []>} : vector<32x128xf32>, vector<32x16xf32>, vector<128x16xf32> -> vector<128x16xf32>
    %cst_30 = arith.constant dense<0xFF800000> : vector<128xf32>
    %70 = vector.multi_reduction <maximumf>, %69, %cst_30 [1] : vector<128x16xf32> to vector<128xf32>
    %71 = vector.shape_cast %70 : vector<128xf32> to vector<128x1xf32>
    %72 = vector.broadcast %71 : vector<128x1xf32> to vector<128x16xf32>
    %73 = arith.subf %69, %72 : vector<128x16xf32>
    %74 = math.exp %73 : vector<128x16xf32>
    %cst_31 = arith.constant dense<0.000000e+00> : vector<128xf32>
    %75 = vector.multi_reduction <add>, %74, %cst_31 [1] : vector<128x16xf32> to vector<128xf32>
    %76 = vector.shape_cast %75 : vector<128xf32> to vector<128x1xf32>
    %77 = vector.broadcast %76 : vector<128x1xf32> to vector<128x16xf32>
    %78 = arith.divf %74, %77 : vector<128x16xf32>
    %c0_32 = arith.constant 0 : index
    %c0_33 = arith.constant 0 : index
    %c0_34 = arith.constant 0 : index
    %79 = vector.load %arg13[%c0_32, %c0_33, %c0_34] : memref<2x128x16xf32, #tpu.memory_space<vmem>>, vector<1x128x16xf32>
    %80 = vector.shape_cast %79 : vector<1x128x16xf32> to vector<128x16xf32>
    %81 = vector.shape_cast %78 : vector<128x16xf32> to vector<1x128x16xf32>
    tpu.vector_store %arg13[%c0_32, %c0_33, %c0_34], %81 {strides = array<i32>} : memref<2x128x16xf32, #tpu.memory_space<vmem>>, vector<1x128x16xf32>,
    %cst_35 = arith.constant dense<0.000000e+00> : vector<32x128xf32>
    %82 = tpu.matmul %68, %78, %cst_35 {dimension_numbers = #tpu.dot_dimension_numbers<[1], [1], [0], [0], [0, 0, 1, 0], [], []>} : vector<32x16xf32>, vector<128x16xf32>, vector<32x128xf32> -> vector<32x128xf32>
    %83 = vector.extract_strided_slice %65 {offsets = [0, 128], sizes = [32, 128], strides = [1, 1]} : vector<32x256xf32> to vector<32x128xf32>
    %84 = vector.extract_strided_slice %60 {offsets = [0, 16], sizes = [32, 16], strides = [1, 1]} : vector<32x32xf32> to vector<32x16xf32>
    %85 = vector.extract_strided_slice %61 {offsets = [0, 16], sizes = [32, 16], strides = [1, 1]} : vector<32x32xf32> to vector<32x16xf32>
    %cst_36 = arith.constant dense<0.000000e+00> : vector<128x16xf32>
    %86 = tpu.matmul %83, %84, %cst_36 {dimension_numbers = #tpu.dot_dimension_numbers<[0], [0], [1], [1], [0, 1, 1, 1], [], []>} : vector<32x128xf32>, vector<32x16xf32>, vector<128x16xf32> -> vector<128x16xf32>
    %cst_37 = arith.constant dense<0xFF800000> : vector<128xf32>
    %87 = vector.multi_reduction <maximumf>, %86, %cst_37 [1] : vector<128x16xf32> to vector<128xf32>
    %88 = vector.shape_cast %87 : vector<128xf32> to vector<128x1xf32>
    %89 = vector.broadcast %88 : vector<128x1xf32> to vector<128x16xf32>
    %90 = arith.subf %86, %89 : vector<128x16xf32>
    %91 = math.exp %90 : vector<128x16xf32>
    %cst_38 = arith.constant dense<0.000000e+00> : vector<128xf32>
    %92 = vector.multi_reduction <add>, %91, %cst_38 [1] : vector<128x16xf32> to vector<128xf32>
    %93 = vector.shape_cast %92 : vector<128xf32> to vector<128x1xf32>
    %94 = vector.broadcast %93 : vector<128x1xf32> to vector<128x16xf32>
    %95 = arith.divf %91, %94 : vector<128x16xf32>
    %c1_39 = arith.constant 1 : index
    %c0_40 = arith.constant 0 : index
    %c0_41 = arith.constant 0 : index
    %96 = vector.load %arg13[%c1_39, %c0_40, %c0_41] : memref<2x128x16xf32, #tpu.memory_space<vmem>>, vector<1x128x16xf32>
    %97 = vector.shape_cast %96 : vector<1x128x16xf32> to vector<128x16xf32>
    %98 = vector.shape_cast %95 : vector<128x16xf32> to vector<1x128x16xf32>
    tpu.vector_store %arg13[%c1_39, %c0_40, %c0_41], %98 {strides = array<i32>} : memref<2x128x16xf32, #tpu.memory_space<vmem>>, vector<1x128x16xf32>,
    %cst_42 = arith.constant dense<0.000000e+00> : vector<32x128xf32>
    %99 = tpu.matmul %85, %95, %cst_42 {dimension_numbers = #tpu.dot_dimension_numbers<[1], [1], [0], [0], [0, 0, 1, 0], [], []>} : vector<32x16xf32>, vector<128x16xf32>, vector<32x128xf32> -> vector<32x128xf32>
    %100 = tpu.concatenate %82, %99 in 1 : vector<32x128xf32>, vector<32x128xf32> -> vector<32x256xf32>
    %101 = arith.mulf %100, %62 : vector<32x256xf32>
    %c0_43 = arith.constant 0 : index
    %c0_44 = arith.constant 0 : index
    %102 = vector.load %arg11[%c0_43, %c0_44] : memref<256x32xf32, #tpu.memory_space<vmem>>, vector<256x32xf32>
    %cst_45 = arith.constant dense<0.000000e+00> : vector<32x32xf32>
    %103 = tpu.matmul %101, %102, %cst_45 {dimension_numbers = #tpu.dot_dimension_numbers<[1], [0], [0], [1], [0, 0, 1, 1], [], []>} : vector<32x256xf32>, vector<256x32xf32>, vector<32x32xf32> -> vector<32x32xf32>
    %c0_46 = arith.constant 0 : index
    %c0_47 = arith.constant 0 : index
    %104 = vector.load %arg6[%c0_46, %c0_47] : memref<32x32xf32, #tpu.memory_space<vmem>>, vector<32x32xf32>
    %cst_48 = arith.constant dense<0.000000e+00> : vector<32x32xf32>
    %105 = tpu.matmul %104, %103, %cst_48 {dimension_numbers = #tpu.dot_dimension_numbers<[1], [0], [0], [1], [0, 0, 1, 1], [], []>} : vector<32x32xf32>, vector<32x32xf32>, vector<32x32xf32> -> vector<32x32xf32>
    %c0_49 = arith.constant 0 : index
    %c0_50 = arith.constant 0 : index
    %106 = vector.load %arg7[%c0_49, %c0_50] : memref<32x1xf32, #tpu.memory_space<vmem>>, vector<32x1xf32>
    %107 = vector.broadcast %106 : vector<32x1xf32> to vector<32x32xf32>
    %108 = arith.addf %105, %107 : vector<32x32xf32>
    %109 = vector.extract_strided_slice %108 {offsets = [0, 0], sizes = [32, 16], strides = [1, 1]} : vector<32x32xf32> to vector<32x16xf32>
    %110 = arith.addf %3, %109 : vector<32x16xf32>
    %c0_51 = arith.constant 0 : index
    %c0_52 = arith.constant 0 : index
    %c0_53 = arith.constant 0 : index
    %111 = vector.load %arg12[%c0_51, %c0_52, %c0_53] : memref<2x32x16xf32, #tpu.memory_space<vmem>>, vector<1x32x16xf32>
    %112 = vector.shape_cast %111 : vector<1x32x16xf32> to vector<32x16xf32>
    %113 = vector.shape_cast %110 : vector<32x16xf32> to vector<1x32x16xf32>
    tpu.vector_store %arg12[%c0_51, %c0_52, %c0_53], %113 {strides = array<i32>} : memref<2x32x16xf32, #tpu.memory_space<vmem>>, vector<1x32x16xf32>,
    %114 = vector.extract_strided_slice %108 {offsets = [0, 16], sizes = [32, 16], strides = [1, 1]} : vector<32x32xf32> to vector<32x16xf32>
    %115 = arith.addf %5, %114 : vector<32x16xf32>
    %c1_54 = arith.constant 1 : index
    %c0_55 = arith.constant 0 : index
    %c0_56 = arith.constant 0 : index
    %116 = vector.load %arg12[%c1_54, %c0_55, %c0_56] : memref<2x32x16xf32, #tpu.memory_space<vmem>>, vector<1x32x16xf32>
    %117 = vector.shape_cast %116 : vector<1x32x16xf32> to vector<32x16xf32>
    %118 = vector.shape_cast %115 : vector<32x16xf32> to vector<1x32x16xf32>
    tpu.vector_store %arg12[%c1_54, %c0_55, %c0_56], %118 {strides = array<i32>} : memref<2x32x16xf32, #tpu.memory_space<vmem>>, vector<1x32x16xf32>,
    return
  }
  func.func @transform_0(%arg0: i32) -> (i32, i32, i32) {
    %c0_i32 = arith.constant 0 : i32
    %c0_i32_0 = arith.constant 0 : i32
    %c0_i32_1 = arith.constant 0 : i32
    %c0_i32_2 = arith.constant 0 : i32
    return %c0_i32, %c0_i32_0, %c0_i32_1 : i32, i32, i32
  }
  func.func @transform_1(%arg0: i32) -> (i32, i32) {
    %c0_i32 = arith.constant 0 : i32
    %c0_i32_0 = arith.constant 0 : i32
    %c0_i32_1 = arith.constant 0 : i32
    return %c0_i32, %c0_i32_0 : i32, i32
  }
  func.func @transform_2(%arg0: i32) -> (i32, i32) {
    %c0_i32 = arith.constant 0 : i32
    %c0_i32_0 = arith.constant 0 : i32
    %c0_i32_1 = arith.constant 0 : i32
    return %c0_i32, %c0_i32_0 : i32, i32
  }
  func.func @transform_3(%arg0: i32) -> (i32, i32) {
    %c0_i32 = arith.constant 0 : i32
    %c0_i32_0 = arith.constant 0 : i32
    %c0_i32_1 = arith.constant 0 : i32
    return %c0_i32, %c0_i32_0 : i32, i32
  }
  func.func @transform_4(%arg0: i32) -> (i32, i32) {
    %c0_i32 = arith.constant 0 : i32
    %c0_i32_0 = arith.constant 0 : i32
    %c0_i32_1 = arith.constant 0 : i32
    return %c0_i32, %c0_i32_0 : i32, i32
  }
  func.func @transform_5(%arg0: i32) -> (i32, i32) {
    %c0_i32 = arith.constant 0 : i32
    %c0_i32_0 = arith.constant 0 : i32
    %c0_i32_1 = arith.constant 0 : i32
    return %c0_i32, %c0_i32_0 : i32, i32
  }
  func.func @transform_6(%arg0: i32) -> (i32, i32) {
    %c0_i32 = arith.constant 0 : i32
    %c0_i32_0 = arith.constant 0 : i32
    %c0_i32_1 = arith.constant 0 : i32
    return %c0_i32, %c0_i32_0 : i32, i32
  }
  func.func @transform_7(%arg0: i32) -> (i32, i32) {
    %c0_i32 = arith.constant 0 : i32
    %c0_i32_0 = arith.constant 0 : i32
    %c0_i32_1 = arith.constant 0 : i32
    return %c0_i32, %c0_i32_0 : i32, i32
  }
  func.func @transform_8(%arg0: i32) -> (i32, i32) {
    %c0_i32 = arith.constant 0 : i32
    %c0_i32_0 = arith.constant 0 : i32
    %c0_i32_1 = arith.constant 0 : i32
    return %c0_i32, %c0_i32_0 : i32, i32
  }
  func.func @transform_9(%arg0: i32) -> (i32, i32) {
    %c0_i32 = arith.constant 0 : i32
    %c0_i32_0 = arith.constant 0 : i32
    %c0_i32_1 = arith.constant 0 : i32
    return %c0_i32, %c0_i32_0 : i32, i32
  }
  func.func @transform_10(%arg0: i32) -> (i32, i32) {
    %c0_i32 = arith.constant 0 : i32
    %c0_i32_0 = arith.constant 0 : i32
    %c0_i32_1 = arith.constant 0 : i32
    return %c0_i32, %c0_i32_0 : i32, i32
  }
  func.func @transform_11(%arg0: i32) -> (i32, i32, i32) {
    %c0_i32 = arith.constant 0 : i32
    %c0_i32_0 = arith.constant 0 : i32
    %c0_i32_1 = arith.constant 0 : i32
    %c0_i32_2 = arith.constant 0 : i32
    return %c0_i32, %c0_i32_0, %c0_i32_1 : i32, i32, i32
  }
  func.func @transform_12(%arg0: i32) -> (i32, i32, i32) {
    %c0_i32 = arith.constant 0 : i32
    %c0_i32_0 = arith.constant 0 : i32
    %c0_i32_1 = arith.constant 0 : i32
    %c0_i32_2 = arith.constant 0 : i32
    return %c0_i32, %c0_i32_0, %c0_i32_1 : i32, i32, i32
  }
}

</mosaic_0001>

<bundles_post_ra>
// kernel: attention_block_1d.1
= control target key start
LH: loop header
LB: loop body
LE: loop exit
PB: predicated region body
PF: predicated region fallthrough
CT: control target
= control target key end

     0   :  { %vm58_vm0 = vcmask 130048   ;;  %s4255_s0 = inlined_call_operand.vmem [shape: f32[2,32,16], index: 0, kind: input, shape index: {}]   ;;  %s4256_s1 = inlined_call_operand.vmem [shape: f32[32,1], index: 1, kind: input, shape index: {}]   ;;  %s4257_s2 = inlined_call_operand.vmem [shape: f32[32,1], index: 2, kind: input, shape index: {}]   ;;  %s4258_s3 = inlined_call_operand.vmem [shape: f32[96,32], index: 3, kind: input, shape index: {}]   ;;  %s4259_s4 = inlined_call_operand.vmem [shape: f32[96,1], index: 4, kind: input, shape index: {}]   ;;  %s4260_s5 = inlined_call_operand.vmem [shape: f32[32,32], index: 5, kind: input, shape index: {}]   ;;  %s4261_s6 = inlined_call_operand.vmem [shape: f32[32,1], index: 6, kind: input, shape index: {}]   ;;  %s4262_s7 = inlined_call_operand.vmem [shape: f32[32,32], index: 7, kind: input, shape index: {}]   ;;  %s4263_s8 = inlined_call_operand.vmem [shape: f32[32,256], index: 8, kind: input, shape index: {}]   ;;  %s4264_s9 = inlined_call_operand.vmem [shape: f32[32,256], index: 9, kind: input, shape index: {}]   ;;  %s4265_s10 = inlined_call_operand.vmem [shape: f32[256,32], index: 10, kind: input, shape index: {}]   ;;  %s4266_s11 = inlined_call_operand.vmem [shape: f32[2,32,16], index: 11, kind: output, shape index: {0}]   ;;  %s4267_s12 = inlined_call_operand.hbm [shape: f32[2,128,16], index: 12, kind: output, shape index: {1}]  }
   0x1   :  { %v3206_v0 = vld [vmem:[%s4255_s0] sm:$0xff]  ;;  %v3211_v1 = vld [vmem:[%s4255_s0 + $0x8] sm:$0xff] }
   0x2   :  { %v59_v2 = vsel %vm58_vm0, %v3206_v0, 0.0  ;;  %v71_v3 = vmul.f32 %v3206_v0, %v3206_v0  ;;  %v72_v4 = vmul.f32 %v3211_v1, %v3211_v1 }
   0x3   :  { %60 = vadd.xlane.f32.xlu0 %v59_v2 }
   0x4   :  { %18 = vsyncpa [#allocation3], 0  ;;  %v75_v5 = vsel %vm58_vm0, %v71_v3, 0.0  ;;  %v62_v6 = vsel %vm58_vm0, %v3211_v1, 0.0  ;;  %v3225_v7 = vld [vmem:[%s4255_s0 + $0x20] sm:$0xff]  ;;  %v78_v8 = vsel %vm58_vm0, %v72_v4, 0.0 }
   0x5   :  { %76 = vadd.xlane.f32.xlu1 %v75_v5  ;;  %v3231_v9 = vld [vmem:[%s4255_s0 + $0x28] sm:$0xff]  ;;  %v87_v10 = vsel %vm58_vm0, %v3225_v7, 0.0  ;;  %v99_v11 = vmul.f32 %v3225_v7, %v3225_v7  ;;  %v3245_v15 = vld [vmem:[%s4255_s0 + $0x10] sm:$0xff]  ;;  %v3251_v17 = vld [vmem:[%s4255_s0 + $0x18] sm:$0xff]  ;;  %vm134_vm1 = vcmask 261120   ;;  %vm115_vm2 = vcmask 7168  }
   0x6   :  { %v90_v12 = vsel %vm58_vm0, %v3231_v9, 0.0  ;;  %v100_v13 = vmul.f32 %v3231_v9, %v3231_v9  ;;  %v65_v18 = vsel %vm58_vm0, %v3245_v15, 0.0  ;;  %v73_v19 = vmul.f32 %v3245_v15, %v3245_v15  ;;  %v3265_v23 = vld [vmem:[%s4255_s0 + $0x30] sm:$0xff]  ;;  %v3271_v25 = vld [vmem:[%s4255_s0 + $0x38] sm:$0xff]  ;;  %v130_v32 = vld [vmem:[%s4262_s7] sm:$0xff]  ;;  %s3126_s27 = smov 1  }
   0x7   :  { %63 = vadd.xlane.f32.xlu0 %v62_v6  ;;  %v103_v14 = vsel %vm58_vm0, %v99_v11, 0.0  ;;  %v68_v20 = vsel %vm58_vm0, %v3251_v17, 0.0  ;;  %v74_v21 = vmul.f32 %v3251_v17, %v3251_v17  ;;  %v93_v26 = vsel %vm58_vm0, %v3265_v23, 0.0  ;;  %2554 = vmatprep.mubr.msk.f32.mxu0 %vm134_vm1, %v130_v32  ;;  %v131_v63 = vld [vmem:[%s4262_s7 + $0x8] sm:$0xff]  ;;  %v132_v2 = vld [vmem:[%s4262_s7 + $0x10] sm:$0xff]  ;;  %v133_v3 = vld [vmem:[%s4262_s7 + $0x18] sm:$0xff] }
   0x8   :  { %v106_v16 = vsel %vm58_vm0, %v100_v13, 0.0  ;;  %v81_v22 = vsel %vm58_vm0, %v73_v19, 0.0  ;;  %v101_v27 = vmul.f32 %v3265_v23, %v3265_v23  ;;  %v96_v28 = vsel %vm58_vm0, %v3271_v25, 0.0  ;;  %s3127_s7 = smov 125   ;;  %s3128_s14 = smov 2   ;;  %vm3887_vm5 = vmpackc.low %vm58_vm0, %vm58_vm0 }
   0x9   :  { %79 = vadd.xlane.f32.xlu1 %v78_v8  ;;  %v84_v24 = vsel %vm58_vm0, %v74_v21, 0.0  ;;  %v102_v29 = vmul.f32 %v3271_v25, %v3271_v25  ;;  %vm120_vm3 = vcmask 15360   ;;  %vm125_vm4 = vcmask 23552   ;;  %s3130_s19 = smov 126   ;;  %s3135_s22 = smov [#allocation2]  }
   0xa   :  { %v109_v30 = vsel %vm58_vm0, %v101_v27, 0.0  ;;  %s2273_s23 = sshll.u32 %s3135_s22, 4  ;;  %s2274_s23 = int_to_ptr.vmem [resolvable:$true] %s2273_s23 }
   0xb   :  { %88 = vadd.xlane.f32.xlu0 %v87_v10  ;;  %v112_v31 = vsel %vm58_vm0, %v102_v29, 0.0  ;;  %p3107_p1 = scmp.lt.s32.totalorder %s2274_s23, %s2274_s23 }
   0xd   :  { %91 = vadd.xlane.f32.xlu1 %v90_v12 }
   0xf   :  { %104 = vadd.xlane.f32.xlu0 %v103_v14 }
  0x11   :  { %107 = vadd.xlane.f32.xlu1 %v106_v16 }
  0x13   :  { %66 = vadd.xlane.f32.xlu0 %v65_v18 }
  0x15   :  { %69 = vadd.xlane.f32.xlu1 %v68_v20 }
  0x17   :  { %82 = vadd.xlane.f32.xlu0 %v81_v22 }
  0x19   :  { %85 = vadd.xlane.f32.xlu1 %v84_v24 }
  0x1b   :  { %94 = vadd.xlane.f32.xlu0 %v93_v26 }
  0x1d   :  { %97 = vadd.xlane.f32.xlu1 %v96_v28 }
  0x1f   :  { %110 = vadd.xlane.f32.xlu0 %v109_v30 }
  0x21   :  { %113 = vadd.xlane.f32.xlu1 %v112_v31 }
  0x90   :  { %v61_v33 = vpop.xlane.xlu0 %60 }
  0x92   :  { %v77_v34 = vpop.xlane.xlu1 %76 }
  0x93   :  { %v116_v40 = vsel %vm115_vm2, %v61_v33, %v77_v34 }
  0x94   :  { %v64_v35 = vpop.xlane.xlu0 %63 }
  0x96   :  { %v80_v36 = vpop.xlane.xlu1 %79 }
  0x97   :  { %v117_v41 = vsel %vm115_vm2, %v64_v35, %v80_v36 }
  0x98   :  { %v89_v37 = vpop.xlane.xlu0 %88 }
  0x99   :  { %v121_v42 = vsel %vm120_vm3, %v116_v40, %v89_v37 }
  0x9a   :  { %v92_v38 = vpop.xlane.xlu1 %91 }
  0x9b   :  { %v122_v43 = vsel %vm120_vm3, %v117_v41, %v92_v38  ;;  %v3334_v38 = vld [vmem:[%s4256_s1 + $0x8] sm:$0xff] }
  0x9c   :  { %v105_v39 = vpop.xlane.xlu0 %104 }
  0x9d   :  { %v126_v45 = vsel %vm125_vm4, %v121_v42, %v105_v39  ;;  %v41_v39 = vld [vmem:[%s4256_s1] sm:$0xff] }
  0x9e   :  { %v108_v44 = vpop.xlane.xlu1 %107 }
  0x9f   :  { %v127_v46 = vsel %vm125_vm4, %v122_v43, %v108_v44  ;;  %v43_v44 = vld [vmem:[%s4256_s1 + $0x10] sm:$0xff] }
  0xa0   :  { %v67_v47 = vpop.xlane.xlu0 %66  ;;  %v2740_v48 = vpack.c.bf16 %v127_v46, %v126_v45 }
  0xa2   :  { %v70_v49 = vpop.xlane.xlu1 %69  ;;  %2741 = vmatprep.subr.bf16.mxu0 %v2740_v48 }
  0xa3   :  { %2743 = vmatpush3.bf16.msra.mxu0 %v2740_v48  ;;  %v44_v48 = vld [vmem:[%s4256_s1 + $0x18] sm:$0xff]  ;;  %s3131_s1 = smov 127  }
  0xa4   :  { %v83_v50 = vpop.xlane.xlu0 %82 }
  0xa5   :  { %v118_v55 = vsel %vm115_vm2, %v67_v47, %v83_v50  ;;  %v3129_v47 = vmov 0  }
  0xa6   :  { %v86_v51 = vpop.xlane.xlu1 %85  ;;  %2928 = vset.pattern.permute.xlu0 %v3129_v47  ;;  %2929 = vset.pattern.permute.xlu1 %v3129_v47 }
  0xa7   :  { %v119_v56 = vsel %vm115_vm2, %v70_v49, %v86_v51 }
  0xa8   :  { %v95_v52 = vpop.xlane.xlu0 %94 }
  0xa9   :  { %v123_v57 = vsel %vm120_vm3, %v118_v55, %v95_v52 }
  0xaa   :  { %v98_v53 = vpop.xlane.xlu1 %97 }
  0xab   :  { %v124_v58 = vsel %vm120_vm3, %v119_v56, %v98_v53 }
  0xac   :  { %v111_v54 = vpop.xlane.xlu0 %110 }
  0xad   :  { %v128_v60 = vsel %vm125_vm4, %v123_v57, %v111_v54 }
  0xae   :  { %v114_v59 = vpop.xlane.xlu1 %113 }
  0xaf   :  { %v129_v61 = vsel %vm125_vm4, %v124_v58, %v114_v59  ;;  %v46_v59 = vld [vmem:[%s4257_s2 + $0x8] sm:$0xff] }
  0xb0   :  { %v2744_v62 = vpack.c.bf16 %v129_v61, %v128_v60  ;;  %v45_v60 = vld [vmem:[%s4257_s2] sm:$0xff] }
  0xb2   :  { %2745 = vmatprep.subr.bf16.mxu0 %v2744_v62 }
  0xb3   :  { %2747 = vmatpush3.bf16.msra.mxu0 %v2744_v62 }
  0xb6   :  { %2555 = vmatmul.mubr.msk.f32.vlgmr.msra.gmra.mrb[0].mxu0 %vm134_vm1, %v131_v63 }
  0xb7   :  { %2557 = vmatprep.mubr.msk.f32.mxu0 %vm134_vm1, %v132_v2 }
  0xba   :  { %2558 = vmatmul.mubr.msk.f32.gmra.mrb[2].mxu0 %vm134_vm1, %v133_v3  ;;  %v47_v3 = vld [vmem:[%s4257_s2 + $0x10] sm:$0xff] }
 0x189   :  { %v3311_v4 = vpop.f32.mrb[0].mxu0 }
 0x18a   :  { %v3313_v5 = vpop.f32.mrb[1].mxu0  ;;  %v233_v6 = vmul.f32 %v3311_v4, %v3311_v4 }
 0x18b   :  { %v232_v8 = vmul.f32 %v3313_v5, %v3313_v5 }
 0x18c   :  { %242 = vrot.lane.b32.xlu1 %v233_v6, %s3126_s27 }
 0x18d   :  { %240 = vrot.lane.b32.xlu0 %v232_v8, %s3126_s27  ;;  %v3319_v10 = vpop.f32.mrb[2].mxu0 }
 0x18e   :  { %v3321_v11 = vpop.f32.mrb[3].mxu0  ;;  %v235_v13 = vmul.f32 %v3319_v10, %v3319_v10 }
 0x18f   :  { %v234_v12 = vmul.f32 %v3321_v11, %v3321_v11 }
 0x191   :  { %244 = vrot.lane.b32.xlu1 %v234_v12, %s3126_s27  ;;  %v48_v12 = vld [vmem:[%s4257_s2 + $0x18] sm:$0xff]  ;;  %s3132_s2 = smov 16  }
 0x195   :  { %246 = vrot.lane.b32.xlu1 %v235_v13, %s3126_s27 }
 0x1fe   :  { %v243_v14 = vpop.permute.xlu1 %242 }
 0x1ff   :  { %v253_v16 = vsub.f32 %v3311_v4, %v243_v14  ;;  %v241_v18 = vpop.permute.xlu0 %240 }
 0x200   :  { %v252_v19 = vsub.f32 %v3313_v5, %v241_v18 }
 0x201   :  { %v257_v20 = vmax.f32 %v253_v16, 0.0 }
 0x202   :  { %v256_v21 = vmax.f32 %v252_v19, 0.0 }
 0x203   :  { %v261_v22 = vadd.f32 1e-05, %v257_v20  ;;  %v245_v24 = vpop.permute.xlu1 %244 }
 0x204   :  { %v260_v26 = vadd.f32 1e-05, %v256_v21  ;;  %v254_v27 = vsub.f32 %v3321_v11, %v245_v24 }
 0x205   :  { %2950 = vrsqrt.f32 %v261_v22 }
 0x206   :  { %2952 = vrsqrt.f32 %v260_v26  ;;  %v258_v28 = vmax.f32 %v254_v27, 0.0 }
 0x207   :  { %v247_v29 = vpop.permute.xlu1 %246 }
 0x208   :  { %v262_v30 = vadd.f32 1e-05, %v258_v28  ;;  %v255_v31 = vsub.f32 %v3319_v10, %v247_v29 }
 0x20a   :  { %2954 = vrsqrt.f32 %v262_v30  ;;  %v259_v32 = vmax.f32 %v255_v31, 0.0 }
 0x20c   :  { %v263_v33 = vadd.f32 1e-05, %v259_v32 }
 0x20e   :  { %2956 = vrsqrt.f32 %v263_v33 }
 0x20f   :  { %v2951_v34 = vpop.eup %2950 }
 0x210   :  { %v2953_v35 = vpop.eup %2952  ;;  %346 = vrot.lane.b32.xlu1 %v2951_v34, %s3127_s7 }
 0x211   :  { %344 = vrot.lane.b32.xlu0 %v2953_v35, %s3127_s7 }
 0x214   :  { %v2955_v36 = vpop.eup %2954 }
 0x215   :  { %348 = vrot.lane.b32.xlu0 %v2955_v36, %s3127_s7 }
 0x218   :  { %v2957_v37 = vpop.eup %2956 }
 0x219   :  { %350 = vrot.lane.b32.xlu1 %v2957_v37, %s3127_s7 }
 0x282   :  { %v347_v40 = vpop.permute.xlu1 %346 }
 0x283   :  { %v357_v41 = vmul.f32 %v347_v40, %v3334_v38  ;;  %v345_v42 = vpop.permute.xlu0 %344 }
 0x284   :  { %v356_v43 = vmul.f32 %v345_v42, %v41_v39 }
 0x285   :  { %366 = vrot.lane.b32.xlu1 %v357_v41, %s3128_s14 }
 0x286   :  { %364 = vrot.lane.b32.xlu0 %v356_v43, %s3128_s14 }
 0x287   :  { %v349_v45 = vpop.permute.xlu0 %348 }
 0x288   :  { %v358_v46 = vmul.f32 %v349_v45, %v43_v44 }
 0x28a   :  { %368 = vrot.lane.b32.xlu0 %v358_v46, %s3128_s14 }
 0x28b   :  { %v351_v49 = vpop.permute.xlu1 %350 }
 0x28c   :  { %v359_v50 = vmul.f32 %v351_v49, %v44_v48 }
 0x28e   :  { %370 = vrot.lane.b32.xlu1 %v359_v50, %s3128_s14 }
 0x2f7   :  { %v367_v51 = vpop.permute.xlu1 %366 }
 0x2f8   :  { %v377_v52 = vmul.f32 %v3311_v4, %v367_v51  ;;  %v365_v53 = vpop.permute.xlu0 %364  ;;  %v479_v51 = vld [vmem:[%s4259_s4 + $0x18] sm:$0xff] }
 0x2f9   :  { %v376_v54 = vmul.f32 %v365_v53, %v3313_v5  ;;  %v483_v53 = vld [vmem:[%s4259_s4 + $0x38] sm:$0xff] }
 0x2fa   :  { %386 = vrot.lane.b32.xlu1 %v377_v52, %s3130_s19  ;;  %v481_v52 = vld [vmem:[%s4259_s4 + $0x28] sm:$0xff] }
 0x2fb   :  { %384 = vrot.lane.b32.xlu0 %v376_v54, %s3130_s19  ;;  %v722_v54 = vld [vmem:[%s4263_s8 + $0x8] sm:$0xff] }
 0x2fc   :  { %v369_v55 = vpop.permute.xlu0 %368 }
 0x2fd   :  { %v378_v56 = vmul.f32 %v369_v55, %v3321_v11  ;;  %v724_v55 = vld [vmem:[%s4263_s8 + $0x18] sm:$0xff] }
 0x2ff   :  { %388 = vrot.lane.b32.xlu0 %v378_v56, %s3130_s19  ;;  %v721_v56 = vld [vmem:[%s4263_s8] sm:$0xff] }
 0x300   :  { %v371_v57 = vpop.permute.xlu1 %370 }
 0x301   :  { %v379_v58 = vmul.f32 %v3319_v10, %v371_v57  ;;  %v2756_v57 = vpack.c.bf16 %v724_v55, %v722_v54 }
 0x303   :  { %390 = vrot.lane.b32.xlu1 %v379_v58, %s3130_s19  ;;  %272 = vrot.lane.b32.xlu0 %v2953_v35, %s3131_s1  ;;  %v723_v58 = vld [vmem:[%s4263_s8 + $0x10] sm:$0xff] }
 0x304   :  { %2757 = vmatprep.subr.bf16.mxu0 %v2756_v57 }
 0x307   :  { %274 = vrot.lane.b32.xlu1 %v2951_v34, %s3131_s1  ;;  %276 = vrot.lane.b32.xlu0 %v2955_v36, %s3131_s1 }
 0x30b   :  { %278 = vrot.lane.b32.xlu1 %v2957_v37, %s3131_s1  ;;  %401 = vperm.xlu0 %2928, %v356_v43   ;;  %v476_v43 = vld [vmem:[%s4259_s4] sm:$0xff] }
 0x30f   :  { %405 = vperm.xlu1 %2929, %v357_v41   ;;  %413 = vperm.xlu0 %2928, %v359_v50   ;;  %v480_v50 = vld [vmem:[%s4259_s4 + $0x20] sm:$0xff] }
 0x313   :  { %409 = vperm.xlu1 %2929, %v358_v46  }
 0x36c   :  { %v387_v61 = vpop.permute.xlu1 %386 }
 0x36d   :  { %v397_v62 = vsub.f32 %v46_v59, %v387_v61  ;;  %v385_v63 = vpop.permute.xlu0 %384 }
 0x36e   :  { %v396_v2 = vsub.f32 %v45_v60, %v385_v63 }
 0x36f   :  { %427 = vperm.xlu0 %2928, %v397_v62  }
 0x370   :  { %422 = vperm.xlu1 %2929, %v396_v2  }
 0x371   :  { %v389_v6 = vpop.permute.xlu0 %388 }
 0x372   :  { %v398_v8 = vsub.f32 %v47_v3, %v389_v6 }
 0x374   :  { %432 = vperm.xlu1 %2929, %v398_v8  }
 0x375   :  { %v391_v13 = vpop.permute.xlu1 %390  ;;  %v273_v14 = vpop.permute.xlu0 %272 }
 0x376   :  { %v399_v16 = vsub.f32 %v48_v12, %v391_v13  ;;  %v284_v18 = vmul.f32 %v273_v14, %v41_v39 }
 0x378   :  { %v288_v19 = vmul.f32 %v284_v18, %v3313_v5  ;;  %437 = vperm.xlu0 %2928, %v399_v16   ;;  %298 = vperm.xlu1 %2929, %v284_v18  }
 0x379   :  { %v275_v20 = vpop.permute.xlu1 %274  ;;  %v277_v21 = vpop.permute.xlu0 %276 }
 0x37a   :  { %v285_v22 = vmul.f32 %v275_v20, %v3334_v38  ;;  %v286_v24 = vmul.f32 %v277_v21, %v43_v44  ;;  %v292_v26 = vsub.f32 %v45_v60, %v288_v19  ;;  %v464_v44 = vld [vmem:[%s4258_s3] sm:$0xff] }
 0x37b   :  { %2568 = vmatprep.mubr.msk.f32.mxu1 %vm134_vm1, %v464_v44 }
 0x37c   :  { %v289_v27 = vmul.f32 %v3311_v4, %v285_v22  ;;  %303 = vperm.xlu0 %2928, %v285_v22   ;;  %322 = vperm.xlu1 %2929, %v292_v26   ;;  %v290_v29 = vmul.f32 %v286_v24, %v3321_v11 }
 0x37d   :  { %v279_v28 = vpop.permute.xlu1 %278 }
 0x37e   :  { %v287_v30 = vmul.f32 %v279_v28, %v44_v48  ;;  %v293_v31 = vsub.f32 %v46_v59, %v289_v27  ;;  %v294_v32 = vsub.f32 %v47_v3, %v290_v29  ;;  %v478_v48 = vld [vmem:[%s4259_s4 + $0x10] sm:$0xff]  ;;  %v2758_v59 = vpack.c.bf16 %v723_v58, %v721_v56 }
 0x380   :  { %327 = vperm.xlu0 %2928, %v293_v31   ;;  %308 = vperm.xlu1 %2929, %v286_v24   ;;  %v291_v5 = vmul.f32 %v3319_v10, %v287_v30 }
 0x381   :  { %2759 = vmatpush1.bf16.msra.mxu0 %v2758_v59 }
 0x382   :  { %v295_v33 = vsub.f32 %v48_v12, %v291_v5 }
 0x384   :  { %313 = vperm.xlu0 %2928, %v287_v30   ;;  %332 = vperm.xlu1 %2929, %v294_v32  }
 0x388   :  { %337 = vperm.xlu0 %2928, %v295_v33   ;;  %v465_v33 = vld [vmem:[%s4258_s3 + $0x8] sm:$0xff] }
 0x38a   :  { %v402_v34 = vpop.permute.xlu0 %401 }
 0x38b   :  { %v416_v38 = vmul.f32 %v3225_v7, %v402_v34  ;;  %v468_v34 = vld [vmem:[%s4258_s3 + $0x20] sm:$0xff] }
 0x38e   :  { %v406_v35 = vpop.permute.xlu1 %405  ;;  %v414_v36 = vpop.permute.xlu0 %413 }
 0x38f   :  { %v417_v37 = vmul.f32 %v3231_v9, %v406_v35  ;;  %v419_v9 = vmul.f32 %v3271_v25, %v414_v36  ;;  %v482_v25 = vld [vmem:[%s4259_s4 + $0x30] sm:$0xff]  ;;  %v469_v35 = vld [vmem:[%s4258_s3 + $0x28] sm:$0xff] }
 0x390   :  { %v470_v36 = vld [vmem:[%s4258_s3 + $0x30] sm:$0xff] }
 0x392   :  { %v410_v4 = vpop.permute.xlu1 %409 }
 0x393   :  { %v418_v7 = vmul.f32 %v3265_v23, %v410_v4  ;;  %v477_v23 = vld [vmem:[%s4259_s4 + $0x8] sm:$0xff]  ;;  %v471_v4 = vld [vmem:[%s4258_s3 + $0x38] sm:$0xff] }
 0x3ee   :  { %v428_v11 = vpop.permute.xlu0 %427 }
 0x3ef   :  { %v441_v39 = vadd.f32 %v428_v11, %v417_v37  ;;  %v423_v40 = vpop.permute.xlu1 %422  ;;  %v726_v37 = vld [vmem:[%s4263_s8 + $0x28] sm:$0xff] }
 0x3f0   :  { %v440_v41 = vadd.f32 %v423_v40, %v416_v38  ;;  %v728_v38 = vld [vmem:[%s4263_s8 + $0x38] sm:$0xff]  ;;  %v727_v40 = vld [vmem:[%s4263_s8 + $0x30] sm:$0xff] }
 0x3f1   :  { %v2760_v11 = vpack.c.bf16 %v728_v38, %v726_v37  ;;  %v720_v37 = vld [vmem:[%s4264_s9 + $0x38] sm:$0xff] }
 0x3f2   :  { %v2930_v42 = vpack.i.bf16 %v441_v39, %v440_v41  ;;  %v725_v39 = vld [vmem:[%s4263_s8 + $0x20] sm:$0xff]  ;;  %s3134_s8 = smov 112  }
 0x3f3   :  { %v433_v10 = vpop.permute.xlu1 %432  ;;  %v2762_v41 = vpack.c.bf16 %v727_v40, %v725_v39  ;;  %2761 = vmatprep.subr.bf16.mxu0 %v2760_v11 }
 0x3f4   :  { %2931 = vrot.lane.b32.xlu1 %v2930_v42, %s3132_s2  ;;  %v442_v46 = vadd.f32 %v433_v10, %v418_v7  ;;  %v3133_v42 = vmov 0.0  }
 0x3f5   :  { %2763 = vmatpush1.bf16.msra.mxu0 %v2762_v41  ;;  %805 = vmatprep.mubr.f32.mxu0 %v3133_v42  ;;  %v484_v41 = vld [vmem:[%s4259_s4 + $0x40] sm:$0xff] }
 0x3f7   :  { %v438_v45 = vpop.permute.xlu0 %437  ;;  %v299_v60 = vpop.permute.xlu1 %298 }
 0x3f8   :  { %v443_v47 = vadd.f32 %v438_v45, %v419_v9  ;;  %490 = vperm.xlu1 %2929, %v476_v43   ;;  %v316_v8 = vmul.f32 %v299_v60, %v3206_v0 }
 0x3fa   :  { %v2935_v49 = vpack.i.bf16 %v443_v47, %v442_v46 }
 0x3fb   :  { %v323_v61 = vpop.permute.xlu1 %322  ;;  %v304_v62 = vpop.permute.xlu0 %303 }
 0x3fc   :  { %500 = vperm.xlu1 %2929, %v478_v48   ;;  %2936 = vrot.lane.b32.xlu0 %v2935_v49, %s3132_s2  ;;  %v317_v12 = vmul.f32 %v304_v62, %v3211_v1  ;;  %v340_v14 = vadd.f32 %v323_v61, %v316_v8 }
 0x3ff   :  { %v309_v63 = vpop.permute.xlu1 %308  ;;  %v328_v2 = vpop.permute.xlu0 %327 }
 0x400   :  { %510 = vperm.xlu1 %2929, %v480_v50   ;;  %495 = vperm.xlu0 %2928, %v477_v23   ;;  %v341_v16 = vadd.f32 %v328_v2, %v317_v12  ;;  %v318_v26 = vmul.f32 %v309_v63, %v3245_v15  ;;  %v466_v15 = vld [vmem:[%s4258_s3 + $0x10] sm:$0xff] }
 0x403   :  { %v333_v3 = vpop.permute.xlu1 %332  ;;  %v314_v6 = vpop.permute.xlu0 %313 }
 0x404   :  { %520 = vperm.xlu1 %2929, %v482_v25   ;;  %505 = vperm.xlu0 %2928, %v479_v51   ;;  %v319_v27 = vmul.f32 %v314_v6, %v3251_v17  ;;  %v342_v28 = vadd.f32 %v333_v3, %v318_v26  ;;  %v467_v17 = vld [vmem:[%s4258_s3 + $0x18] sm:$0xff] }
 0x407   :  { %v338_v22 = vpop.permute.xlu0 %337 }
 0x408   :  { %515 = vperm.xlu0 %2928, %v481_v52   ;;  %v343_v1 = vadd.f32 %v338_v22, %v319_v27  ;;  %v713_v22 = vld [vmem:[%s4264_s9] sm:$0xff] }
 0x40c   :  { %525 = vperm.xlu0 %2928, %v483_v53  }
 0x466   :  { %v2932_v13 = vpop.permute.xlu1 %2931 }
 0x467   :  { %v2934_v18 = vunpack.i.h.bf16 %v2932_v13  ;;  %v2933_v19 = vunpack.i.l.bf16 %v2932_v13 }
 0x469   :  { %v460_v20 = vsel %vm58_vm0, %v340_v14, %v2933_v19  ;;  %v461_v21 = vsel %vm58_vm0, %v341_v16, %v2934_v18  ;;  %v472_v14 = vld [vmem:[%s4258_s3 + $0x40] sm:$0xff]  ;;  %v473_v16 = vld [vmem:[%s4258_s3 + $0x48] sm:$0xff] }
 0x46a   :  { %v2748_v24 = vpack.c.bf16 %v461_v21, %v460_v20 }
 0x46c   :  { %2749 = vmatprep.subr.bf16.mxu1 %v2748_v24 }
 0x46d   :  { %2751 = vmatpush3.bf16.msra.mxu1 %v2748_v24  ;;  %v714_v24 = vld [vmem:[%s4264_s9 + $0x8] sm:$0xff] }
 0x46e   :  { %v2937_v0 = vpop.permute.xlu0 %2936 }
 0x46f   :  { %v2939_v29 = vunpack.i.h.bf16 %v2937_v0  ;;  %v2938_v30 = vunpack.i.l.bf16 %v2937_v0 }
 0x471   :  { %v462_v31 = vsel %vm58_vm0, %v342_v28, %v2938_v30  ;;  %v463_v5 = vsel %vm58_vm0, %v343_v1, %v2939_v29  ;;  %v715_v1 = vld [vmem:[%s4264_s9 + $0x10] sm:$0xff]  ;;  %v716_v29 = vld [vmem:[%s4264_s9 + $0x18] sm:$0xff] }
 0x472   :  { %v2752_v32 = vpack.c.bf16 %v463_v5, %v462_v31 }
 0x474   :  { %2753 = vmatprep.subr.bf16.mxu1 %v2752_v32 }
 0x475   :  { %2755 = vmatpush3.bf16.msra.mxu1 %v2752_v32 }
 0x477   :  { %v491_v43 = vpop.permute.xlu1 %490 }
 0x478   :  { %2569 = vmatmul.mubr.msk.f32.vlgmr.msra.gmra.mrb[0].mxu1 %vm134_vm1, %v465_v33  ;;  %v717_v33 = vld [vmem:[%s4264_s9 + $0x20] sm:$0xff] }
 0x479   :  { %2571 = vmatprep.mubr.msk.f32.mxu1 %vm134_vm1, %v466_v15  ;;  %v718_v15 = vld [vmem:[%s4264_s9 + $0x28] sm:$0xff] }
 0x47b   :  { %v501_v7 = vpop.permute.xlu1 %500 }
 0x47c   :  { %2572 = vmatmul.mubr.msk.f32.gmra.mrb[2].mxu1 %vm134_vm1, %v467_v17 }
 0x47d   :  { %2574 = vmatprep.mubr.msk.f32.mxu1 %vm134_vm1, %v468_v34 }
 0x47f   :  { %v496_v10 = vpop.permute.xlu0 %495  ;;  %v511_v25 = vpop.permute.xlu1 %510 }
 0x480   :  { %2575 = vmatmul.mubr.msk.f32.gmra.mrb[4].mxu1 %vm134_vm1, %v469_v35 }
 0x481   :  { %2577 = vmatprep.mubr.msk.f32.mxu1 %vm134_vm1, %v470_v36 }
 0x483   :  { %v506_v44 = vpop.permute.xlu0 %505  ;;  %v521_v63 = vpop.permute.xlu1 %520 }
 0x484   :  { %2578 = vmatmul.mubr.msk.f32.gmra.mrb[6].mxu1 %vm134_vm1, %v471_v4  ;;  %v719_v4 = vld [vmem:[%s4264_s9 + $0x30] sm:$0xff] }
 0x485   :  { %2580 = vmatprep.mubr.msk.f32.mxu1 %vm134_vm1, %v472_v14 }
 0x487   :  { %v516_v23 = vpop.permute.xlu0 %515 }
 0x488   :  { %2581 = vmatmul.mubr.msk.f32.gmra.mrb[8].mxu1 %vm134_vm1, %v473_v16 }
 0x48b   :  { %v526_v57 = vpop.permute.xlu0 %525 }
 0x54b   :  { %v2570_v9 = vpop.f32.mrb[0].mxu1 }
 0x54c   :  { %v650_v45 = vpop.f32.mrb[1].mxu1  ;;  %v656_v47 = vadd.f32 %v2570_v9, %v496_v10 }
 0x54d   :  { %v651_v46 = vadd.f32 %v650_v45, %v491_v43  ;;  %v474_v43 = vld [vmem:[%s4258_s3 + $0x50] sm:$0xff] }
 0x54e   :  { %v710_v51 = vmul.f32 0.5, %v656_v47  ;;  %2583 = vmatprep.mubr.msk.f32.mxu1 %vm134_vm1, %v474_v43 }
 0x54f   :  { %v709_v48 = vmul.f32 0.5, %v651_v46  ;;  %v2573_v49 = vpop.f32.mrb[2].mxu1 }
 0x550   :  { %v660_v50 = vpop.f32.mrb[3].mxu1  ;;  %v666_v58 = vadd.f32 %v2573_v49, %v506_v44  ;;  %v475_v44 = vld [vmem:[%s4258_s3 + $0x58] sm:$0xff] }
 0x551   :  { %2306 = vmatmul.mubr.msk.f32.vlgmr.msra.gmra.mrb[4].mxu0 %vm134_vm1, %v709_v48  ;;  %v661_v52 = vadd.f32 %v660_v50, %v501_v7  ;;  %2584 = vmatmul.mubr.msk.f32.gmra.mrb[10].mxu1 %vm134_vm1, %v475_v44 }
 0x552   :  { %811 = vmatprep.mubr.f32.mxu0 %v3133_v42  ;;  %v712_v8 = vmul.f32 0.5, %v666_v58 }
 0x553   :  { %v2576_v53 = vpop.f32.mrb[4].mxu1  ;;  %v711_v59 = vmul.f32 0.5, %v661_v52 }
 0x554   :  { %v676_v54 = vadd.f32 %v2576_v53, %v516_v23  ;;  %v670_v55 = vpop.f32.mrb[5].mxu1 }
 0x555   :  { %v671_v56 = vadd.f32 %v670_v55, %v511_v25  ;;  %2307 = vmatmul.mubr.msk.f32.gmra.mrb[6].mxu0 %vm134_vm1, %v710_v51 }
 0x556   :  { %817 = vmatprep.mubr.f32.mxu0 %v3133_v42 }
 0x557   :  { %v2940_v60 = vpack.i.bf16 %v676_v54, %v671_v56  ;;  %v2764_v61 = vpack.c.bf16 %v676_v54, %v671_v56  ;;  %v2579_v62 = vpop.f32.mrb[6].mxu1 }
 0x558   :  { %v686_v2 = vadd.f32 %v2579_v62, %v526_v57  ;;  %v680_v3 = vpop.f32.mrb[7].mxu1 }
 0x559   :  { %v681_v6 = vadd.f32 %v680_v3, %v521_v63  ;;  %2941 = vrot.lane.b32.xlu0 %v2940_v60, %s3134_s8  ;;  %2308 = vmatmul.mubr.msk.f32.gmra.mrb[8].mxu0 %vm134_vm1, %v711_v59 }
 0x55a   :  { %2765 = vmatprep.subr.bf16.mxu0 %v2764_v61  ;;  %823 = vmatprep.mubr.f32.mxu0 %v3133_v42 }
 0x55b   :  { %v2945_v12 = vpack.i.bf16 %v686_v2, %v681_v6  ;;  %v2768_v13 = vpack.c.bf16 %v686_v2, %v681_v6  ;;  %2767 = vmatpush3.bf16.msra.mxu0 %v2764_v61  ;;  %v3500_v42 = vpop.f32.mrb[8].mxu1 }
 0x55c   :  { %v3502_v10 = vpop.f32.mrb[9].mxu1 }
 0x55d   :  { %2946 = vrot.lane.b32.xlu0 %v2945_v12, %s3134_s8  ;;  %2309 = vmatmul.mubr.msk.f32.gmra.mrb[10].mxu0 %vm134_vm1, %v712_v8 }
 0x55e   :  { %2769 = vmatprep.subr.bf16.mxu0 %v2768_v13 }
 0x55f   :  { %2771 = vmatpush3.bf16.msra.mxu0 %v2768_v13 }
 0x5cb   :  { %v2942_v18 = vpop.permute.xlu0 %2941 }
 0x5cc   :  { %v2944_v19 = vunpack.i.h.bf16 %v2942_v18  ;;  %v2943_v20 = vunpack.i.l.bf16 %v2942_v18 }
 0x5ce   :  { %v2820_v21 = vpack.c.bf16 %v2944_v19, %v2943_v20 }
 0x5cf   :  { %v2947_v9 = vpop.permute.xlu0 %2946 }
 0x5d0   :  { %2821 = vmatprep.subr.bf16.mxu0 %v2820_v21  ;;  %v2949_v45 = vunpack.i.h.bf16 %v2947_v9  ;;  %v2948_v46 = vunpack.i.l.bf16 %v2947_v9 }
 0x5d2   :  { %v2824_v49 = vpack.c.bf16 %v2949_v45, %v2948_v46 }
 0x624   :  { %v807_v26 = vpop.f32.mrb[4].mxu0 }
 0x625   :  { %v830_v27 = vmul.f32 %v807_v26, %v713_v22  ;;  %v809_v0 = vpop.f32.mrb[5].mxu0 }
 0x626   :  { %v831_v28 = vmul.f32 %v809_v0, %v714_v24 }
 0x627   :  { %838 = vxpose.xlu1.b32.start [1/4] (short) %v830_v27, 128 }
 0x628   :  { %1400 = vxpose.xlu0.b32.start [1/4] (short) %v831_v28, 128  ;;  %v813_v30 = vpop.f32.mrb[6].mxu0 }
 0x629   :  { %v832_v31 = vmul.f32 %v813_v30, %v715_v1  ;;  %v815_v5 = vpop.f32.mrb[7].mxu0 }
 0x62a   :  { %v833_v32 = vmul.f32 %v815_v5, %v716_v29 }
 0x62b   :  { %839 = vxpose.xlu1.b32.cont [2/4] (short) %v832_v31, 128 }
 0x62c   :  { %1401 = vxpose.xlu0.b32.cont [2/4] (short) %v833_v32, 128  ;;  %v819_v17 = vpop.f32.mrb[8].mxu0 }
 0x62d   :  { %v834_v34 = vmul.f32 %v819_v17, %v717_v33  ;;  %v821_v35 = vpop.f32.mrb[9].mxu0 }
 0x62e   :  { %v835_v36 = vmul.f32 %v821_v35, %v718_v15 }
 0x62f   :  { %840 = vxpose.xlu1.b32.cont [3/4] (short) %v834_v34, 128 }
 0x630   :  { %1402 = vxpose.xlu0.b32.cont [3/4] (short) %v835_v36, 128  ;;  %v825_v38 = vpop.f32.mrb[10].mxu0 }
 0x631   :  { %v836_v11 = vmul.f32 %v825_v38, %v719_v4  ;;  %v827_v39 = vpop.f32.mrb[11].mxu0 }
 0x632   :  { %v837_v40 = vmul.f32 %v827_v39, %v720_v37 }
 0x633   :  { %841 = vxpose.xlu1.b32.end [4/4] (short) %v836_v11, 128 }
 0x634   :  { %1403 = vxpose.xlu0.b32.end [4/4] (short) %v837_v40, 128 }
 0x681   :  { %530 = vperm.xlu1 %2929, %v484_v41  }
 0x6a7   :  { %v854_v7 = vpop.trf.xlu1 }
 0x6a8   :  { %2594 = vmatprep.mubr.msk.f32.mxu0 %vm134_vm1, %v854_v7  ;;  %v1416_v47 = vpop.trf.xlu0 }
 0x6ab   :  { %v855_v48 = vpop.trf.xlu1 }
 0x6ac   :  { %2595 = vmatmul.mubr.msk.f32.vlgmr.msra.gmra.mrb[12].mxu0 %vm134_vm1, %v855_v48  ;;  %v1417_v50 = vpop.trf.xlu0 }
 0x6ad   :  { %2823 = vmatpush3.bf16.msra.mxu0 %v2820_v21 }
 0x6ae   :  { %2825 = vmatprep.subr.bf16.mxu0 %v2824_v49 }
 0x6af   :  { %v856_v23 = vpop.trf.xlu1 }
 0x6b0   :  { %2597 = vmatprep.mubr.msk.f32.mxu0 %vm134_vm1, %v856_v23  ;;  %v1418_v51 = vpop.trf.xlu0 }
 0x6b1   :  { %2827 = vmatpush3.bf16.msra.mxu0 %v2824_v49 }
 0x6b3   :  { %v857_v25 = vpop.trf.xlu1 }
 0x6b4   :  { %2598 = vmatmul.mubr.msk.f32.gmra.mrb[14].mxu0 %vm134_vm1, %v857_v25  ;;  %v1419_v53 = vpop.trf.xlu0 }
 0x6b7   :  { %v858_v52 = vpop.trf.xlu1 }
 0x6b8   :  { %2600 = vmatprep.mubr.msk.f32.mxu0 %vm134_vm1, %v858_v52  ;;  %v1420_v56 = vpop.trf.xlu0 }
 0x6bb   :  { %v859_v54 = vpop.trf.xlu1 }
 0x6bc   :  { %2601 = vmatmul.mubr.msk.f32.gmra.mrb[16].mxu0 %vm134_vm1, %v859_v54  ;;  %v1421_v58 = vpop.trf.xlu0 }
 0x6bf   :  { %v860_v55 = vpop.trf.xlu1 }
 0x6c0   :  { %2603 = vmatprep.mubr.msk.f32.mxu0 %vm134_vm1, %v860_v55  ;;  %v1422_v61 = vpop.trf.xlu0 }
 0x6c3   :  { %v861_v57 = vpop.trf.xlu1 }
 0x6c4   :  { %2604 = vmatmul.mubr.msk.f32.gmra.mrb[18].mxu0 %vm134_vm1, %v861_v57  ;;  %v1423_v63 = vpop.trf.xlu0 }
 0x6c7   :  { %v862_v59 = vpop.trf.xlu1 }
 0x6c8   :  { %2606 = vmatprep.mubr.msk.f32.mxu0 %vm134_vm1, %v862_v59  ;;  %v1424_v6 = vpop.trf.xlu0 }
 0x6cb   :  { %v863_v60 = vpop.trf.xlu1 }
 0x6cc   :  { %2607 = vmatmul.mubr.msk.f32.gmra.mrb[20].mxu0 %vm134_vm1, %v863_v60  ;;  %v1425_v12 = vpop.trf.xlu0 }
 0x6cf   :  { %v864_v62 = vpop.trf.xlu1 }
 0x6d0   :  { %2609 = vmatprep.mubr.msk.f32.mxu0 %vm134_vm1, %v864_v62  ;;  %v1426_v16 = vpop.trf.xlu0 }
 0x6d3   :  { %v865_v2 = vpop.trf.xlu1 }
 0x6d4   :  { %2610 = vmatmul.mubr.msk.f32.gmra.mrb[22].mxu0 %vm134_vm1, %v865_v2  ;;  %v1427_v18 = vpop.trf.xlu0 }
 0x6d7   :  { %v866_v3 = vpop.trf.xlu1 }
 0x6d8   :  { %2612 = vmatprep.mubr.msk.f32.mxu0 %vm134_vm1, %v866_v3  ;;  %v1428_v19 = vpop.trf.xlu0 }
 0x6db   :  { %v867_v8 = vpop.trf.xlu1 }
 0x6dc   :  { %2613 = vmatmul.mubr.msk.f32.gmra.mrb[24].mxu0 %vm134_vm1, %v867_v8  ;;  %v1429_v20 = vpop.trf.xlu0 }
 0x6df   :  { %v868_v13 = vpop.trf.xlu1 }
 0x6e0   :  { %2615 = vmatprep.mubr.msk.f32.mxu0 %vm134_vm1, %v868_v13  ;;  %v1430_v21 = vpop.trf.xlu0 }
 0x6e3   :  { %v869_v14 = vpop.trf.xlu1 }
 0x6e4   :  { %2616 = vmatmul.mubr.msk.f32.gmra.mrb[26].mxu0 %vm134_vm1, %v869_v14  ;;  %v1431_v26 = vpop.trf.xlu0 }
 0x6e5   :  { %2664 = vmatprep.mubr.msk.f32.mxu0 %vm134_vm1, %v1416_v47 }
 0x6e8   :  { %2665 = vmatmul.mubr.msk.f32.vlgmr.msra.gmra.mrb[28].mxu0 %vm134_vm1, %v1417_v50 }
 0x6e9   :  { %2667 = vmatprep.mubr.msk.f32.mxu0 %vm134_vm1, %v1418_v51 }
 0x6ec   :  { %2668 = vmatmul.mubr.msk.f32.gmra.mrb[30].mxu0 %vm134_vm1, %v1419_v53 }
 0x6ed   :  { %2670 = vmatprep.mubr.msk.f32.mxu0 %vm134_vm1, %v1420_v56 }
 0x6f0   :  { %2671 = vmatmul.mubr.msk.f32.gmra.mrb[32].mxu0 %vm134_vm1, %v1421_v58 }
 0x6f1   :  { %2673 = vmatprep.mubr.msk.f32.mxu0 %vm134_vm1, %v1422_v61 }
 0x6f4   :  { %2674 = vmatmul.mubr.msk.f32.gmra.mrb[34].mxu0 %vm134_vm1, %v1423_v63 }
 0x6f5   :  { %2676 = vmatprep.mubr.msk.f32.mxu0 %vm134_vm1, %v1424_v6 }
 0x6f8   :  { %2677 = vmatmul.mubr.msk.f32.gmra.mrb[36].mxu0 %vm134_vm1, %v1425_v12 }
 0x6f9   :  { %2679 = vmatprep.mubr.msk.f32.mxu0 %vm134_vm1, %v1426_v16 }
 0x6fc   :  { %2680 = vmatmul.mubr.msk.f32.gmra.mrb[38].mxu0 %vm134_vm1, %v1427_v18 }
 0x6fd   :  { %2682 = vmatprep.mubr.msk.f32.mxu0 %vm134_vm1, %v1428_v19 }
 0x700   :  { %v531_v22 = vpop.permute.xlu1 %530  ;;  %2683 = vmatmul.mubr.msk.f32.gmra.mrb[40].mxu0 %vm134_vm1, %v1429_v20 }
 0x701   :  { %v3543_v24 = vadd.f32 %v3502_v10, %v531_v22  ;;  %2685 = vmatprep.mubr.msk.f32.mxu0 %vm134_vm1, %v1430_v21 }
 0x703   :  { %2650 = vmatprep.mubr.msk.f32.mxu1 %vm58_vm0, %v3543_v24 }
 0x704   :  { %2686 = vmatmul.mubr.msk.f32.gmra.mrb[42].mxu0 %vm134_vm1, %v1431_v26 }
 0x77f   :  { %v3549_v27 = vpop.f32.mrb[12].mxu0 }
 0x780   :  { %v3551_v0 = vpop.f32.mrb[13].mxu0  ;;  %v1066_v28 = vsel %vm58_vm0, %v3549_v27, -inf }
 0x781   :  { %1067 = vmax.xlane.f32.xlu0 %v1066_v28  ;;  %v1063_v1 = vsel %vm58_vm0, %v3551_v0, -inf }
 0x782   :  { %1064 = vmax.xlane.f32.xlu1 %v1063_v1  ;;  %v486_v1 = vld [vmem:[%s4259_s4 + $0x50] sm:$0xff] }
 0x787   :  { %v3557_v29 = vpop.f32.mrb[14].mxu0 }
 0x788   :  { %v3559_v30 = vpop.f32.mrb[15].mxu0  ;;  %v1072_v31 = vsel %vm58_vm0, %v3557_v29, -inf }
 0x789   :  { %1073 = vmax.xlane.f32.xlu0 %v1072_v31  ;;  %v1069_v5 = vsel %vm58_vm0, %v3559_v30, -inf  ;;  %v3678_v31 = vpop.f32.mrb[10].mxu1 }
 0x78a   :  { %1070 = vmax.xlane.f32.xlu1 %v1069_v5  ;;  %v3680_v5 = vpop.f32.mrb[11].mxu1 }
 0x78f   :  { %v3565_v32 = vpop.f32.mrb[16].mxu0 }
 0x790   :  { %v3567_v33 = vpop.f32.mrb[17].mxu0  ;;  %v1078_v15 = vsel %vm58_vm0, %v3565_v32, -inf }
 0x791   :  { %1079 = vmax.xlane.f32.xlu0 %v1078_v15  ;;  %v1075_v17 = vsel %vm58_vm0, %v3567_v33, -inf  ;;  %v485_v15 = vld [vmem:[%s4259_s4 + $0x48] sm:$0xff] }
 0x792   :  { %1076 = vmax.xlane.f32.xlu1 %v1075_v17 }
 0x797   :  { %v3573_v34 = vpop.f32.mrb[18].mxu0 }
 0x798   :  { %v3575_v35 = vpop.f32.mrb[19].mxu0  ;;  %v1084_v36 = vsel %vm58_vm0, %v3573_v34, -inf }
 0x799   :  { %1085 = vmax.xlane.f32.xlu0 %v1084_v36  ;;  %v1081_v4 = vsel %vm58_vm0, %v3575_v35, -inf }
 0x79a   :  { %1082 = vmax.xlane.f32.xlu1 %v1081_v4 }
 0x79f   :  { %v3581_v37 = vpop.f32.mrb[20].mxu0 }
 0x7a0   :  { %v3583_v38 = vpop.f32.mrb[21].mxu0  ;;  %v1090_v11 = vsel %vm58_vm0, %v3581_v37, -inf }
 0x7a1   :  { %1091 = vmax.xlane.f32.xlu0 %v1090_v11  ;;  %v1087_v39 = vsel %vm58_vm0, %v3583_v38, -inf }
 0x7a2   :  { %1088 = vmax.xlane.f32.xlu1 %v1087_v39 }
 0x7a7   :  { %v3589_v40 = vpop.f32.mrb[22].mxu0 }
 0x7a8   :  { %v3591_v41 = vpop.f32.mrb[23].mxu0  ;;  %v1096_v10 = vsel %vm58_vm0, %v3589_v40, -inf }
 0x7a9   :  { %1097 = vmax.xlane.f32.xlu0 %v1096_v10  ;;  %v1093_v43 = vsel %vm58_vm0, %v3591_v41, -inf }
 0x7aa   :  { %1094 = vmax.xlane.f32.xlu1 %v1093_v43 }
 0x7af   :  { %v3597_v44 = vpop.f32.mrb[24].mxu0 }
 0x7b0   :  { %v3599_v9 = vpop.f32.mrb[25].mxu0  ;;  %v1102_v7 = vsel %vm58_vm0, %v3597_v44, -inf }
 0x7b1   :  { %1103 = vmax.xlane.f32.xlu0 %v1102_v7  ;;  %v1099_v45 = vsel %vm58_vm0, %v3599_v9, -inf }
 0x7b2   :  { %1100 = vmax.xlane.f32.xlu1 %v1099_v45 }
 0x7b7   :  { %v3605_v46 = vpop.f32.mrb[26].mxu0 }
 0x7b8   :  { %v3607_v47 = vpop.f32.mrb[27].mxu0  ;;  %v1108_v48 = vsel %vm58_vm0, %v3605_v46, -inf }
 0x7b9   :  { %1109 = vmax.xlane.f32.xlu0 %v1108_v48  ;;  %v1105_v49 = vsel %vm58_vm0, %v3607_v47, -inf }
 0x7ba   :  { %1106 = vmax.xlane.f32.xlu1 %v1105_v49 }
 0x7bb   :  { %v3613_v50 = vpop.f32.mrb[28].mxu0 }
 0x7bc   :  { %v3615_v23 = vpop.f32.mrb[29].mxu0  ;;  %v1644_v25 = vsel %vm58_vm0, %v3613_v50, -inf }
 0x7bd   :  { %v1641_v51 = vsel %vm58_vm0, %v3615_v23, -inf }
 0x7be   :  { %1645 = vmax.xlane.f32.xlu1 %v1644_v25  ;;  %1642 = vmax.xlane.f32.xlu0 %v1641_v51 }
 0x7bf   :  { %v3621_v52 = vpop.f32.mrb[30].mxu0 }
 0x7c0   :  { %v3623_v53 = vpop.f32.mrb[31].mxu0  ;;  %v1650_v54 = vsel %vm58_vm0, %v3621_v52, -inf }
 0x7c1   :  { %v1647_v55 = vsel %vm58_vm0, %v3623_v53, -inf }
 0x7c2   :  { %1651 = vmax.xlane.f32.xlu0 %v1650_v54  ;;  %1648 = vmax.xlane.f32.xlu1 %v1647_v55 }
 0x7c3   :  { %v3629_v56 = vpop.f32.mrb[32].mxu0 }
 0x7c4   :  { %v3631_v57 = vpop.f32.mrb[33].mxu0  ;;  %v1656_v58 = vsel %vm58_vm0, %v3629_v56, -inf }
 0x7c5   :  { %v1653_v59 = vsel %vm58_vm0, %v3631_v57, -inf }
 0x7c6   :  { %1657 = vmax.xlane.f32.xlu0 %v1656_v58  ;;  %1654 = vmax.xlane.f32.xlu1 %v1653_v59 }
 0x7c7   :  { %v3637_v60 = vpop.f32.mrb[34].mxu0 }
 0x7c8   :  { %v3639_v61 = vpop.f32.mrb[35].mxu0  ;;  %v1662_v62 = vsel %vm58_vm0, %v3637_v60, -inf }
 0x7c9   :  { %v1659_v63 = vsel %vm58_vm0, %v3639_v61, -inf }
 0x7ca   :  { %1663 = vmax.xlane.f32.xlu0 %v1662_v62  ;;  %1660 = vmax.xlane.f32.xlu1 %v1659_v63 }
 0x7cb   :  { %v3645_v2 = vpop.f32.mrb[36].mxu0 }
 0x7cc   :  { %v3647_v3 = vpop.f32.mrb[37].mxu0  ;;  %v1668_v6 = vsel %vm58_vm0, %v3645_v2, -inf }
 0x7cd   :  { %v1665_v8 = vsel %vm58_vm0, %v3647_v3, -inf }
 0x7ce   :  { %1669 = vmax.xlane.f32.xlu0 %v1668_v6  ;;  %1666 = vmax.xlane.f32.xlu1 %v1665_v8 }
 0x7cf   :  { %v3653_v12 = vpop.f32.mrb[38].mxu0 }
 0x7d0   :  { %v3655_v13 = vpop.f32.mrb[39].mxu0  ;;  %v1674_v14 = vsel %vm58_vm0, %v3653_v12, -inf }
 0x7d1   :  { %v1671_v16 = vsel %vm58_vm0, %v3655_v13, -inf }
 0x7d2   :  { %1675 = vmax.xlane.f32.xlu0 %v1674_v14  ;;  %1672 = vmax.xlane.f32.xlu1 %v1671_v16 }
 0x7d3   :  { %v3661_v18 = vpop.f32.mrb[40].mxu0 }
 0x7d4   :  { %v3663_v19 = vpop.f32.mrb[41].mxu0  ;;  %v1680_v20 = vsel %vm58_vm0, %v3661_v18, -inf }
 0x7d5   :  { %v1677_v21 = vsel %vm58_vm0, %v3663_v19, -inf }
 0x7d6   :  { %1681 = vmax.xlane.f32.xlu0 %v1680_v20  ;;  %1678 = vmax.xlane.f32.xlu1 %v1677_v21 }
 0x7d7   :  { %v3669_v22 = vpop.f32.mrb[42].mxu0 }
 0x7d8   :  { %v1686_v26 = vsel %vm58_vm0, %v3669_v22, -inf  ;;  %v3673_v28 = vpop.f32.mrb[43].mxu0 }
 0x7d9   :  { %v1683_v17 = vsel %vm58_vm0, %v3673_v28, -inf }
 0x7da   :  { %1687 = vmax.xlane.f32.xlu0 %v1686_v26 }
 0x7e7   :  { %540 = vperm.xlu1 %2929, %v486_v1  }
 0x7f0   :  { %535 = vperm.xlu0 %2928, %v485_v15  }
 0x80b   :  { %1684 = vmax.xlane.f32.xlu1 %v1683_v17 }
 0x80e   :  { %v1068_v36 = vpop.xlane.xlu0 %1067 }
 0x80f   :  { %v1112_v4 = vsub.f32 %v3549_v27, %v1068_v36  ;;  %v1065_v11 = vpop.xlane.xlu1 %1064 }
 0x810   :  { %v1111_v39 = vsub.f32 %v3551_v0, %v1065_v11 }
 0x811   :  { %v1129_v10 = vmul.f32 1.442695, %v1112_v4 }
 0x812   :  { %v1127_v43 = vmul.f32 1.442695, %v1111_v39 }
 0x813   :  { %2958 = vpow2.f32 %v1129_v10 }
 0x814   :  { %2960 = vpow2.f32 %v1127_v43 }
 0x816   :  { %v1074_v7 = vpop.xlane.xlu0 %1073 }
 0x817   :  { %v1114_v45 = vsub.f32 %v3557_v29, %v1074_v7  ;;  %v1071_v48 = vpop.xlane.xlu1 %1070 }
 0x818   :  { %v1113_v49 = vsub.f32 %v3559_v30, %v1071_v48 }
 0x819   :  { %v1133_v25 = vmul.f32 1.442695, %v1114_v45 }
 0x81a   :  { %v1131_v51 = vmul.f32 1.442695, %v1113_v49 }
 0x81b   :  { %2962 = vpow2.f32 %v1133_v25 }
 0x81c   :  { %2964 = vpow2.f32 %v1131_v51 }
 0x81d   :  { %v3691_v54 = vpop.eup %2958 }
 0x81e   :  { %v3693_v27 = vpop.eup %2960  ;;  %v1080_v55 = vpop.xlane.xlu0 %1079  ;;  %v1162_v0 = vsel %vm58_vm0, %v3691_v54, 0.0 }
 0x81f   :  { %v1116_v58 = vsub.f32 %v3565_v32, %v1080_v55  ;;  %v1077_v59 = vpop.xlane.xlu1 %1076  ;;  %1163 = vadd.xlane.f32.xlu0 %v1162_v0  ;;  %v1159_v29 = vsel %vm58_vm0, %v3693_v27, 0.0 }
 0x820   :  { %v1115_v30 = vsub.f32 %v3567_v33, %v1077_v59  ;;  %1160 = vadd.xlane.f32.xlu1 %v1159_v29 }
 0x821   :  { %v1137_v62 = vmul.f32 1.442695, %v1116_v58 }
 0x822   :  { %v1135_v63 = vmul.f32 1.442695, %v1115_v30 }
 0x823   :  { %2966 = vpow2.f32 %v1137_v62 }
 0x824   :  { %2968 = vpow2.f32 %v1135_v63 }
 0x825   :  { %v3701_v6 = vpop.eup %2962 }
 0x826   :  { %v3703_v8 = vpop.eup %2964  ;;  %v1086_v14 = vpop.xlane.xlu0 %1085  ;;  %v1168_v32 = vsel %vm58_vm0, %v3701_v6, 0.0 }
 0x827   :  { %v1118_v16 = vsub.f32 %v3573_v34, %v1086_v14  ;;  %v1083_v20 = vpop.xlane.xlu1 %1082  ;;  %1169 = vadd.xlane.f32.xlu0 %v1168_v32  ;;  %v1165_v33 = vsel %vm58_vm0, %v3703_v8, 0.0 }
 0x828   :  { %v1117_v21 = vsub.f32 %v3575_v35, %v1083_v20  ;;  %1166 = vadd.xlane.f32.xlu1 %v1165_v33 }
 0x829   :  { %v1141_v26 = vmul.f32 1.442695, %v1118_v16 }
 0x82a   :  { %v1139_v1 = vmul.f32 1.442695, %v1117_v21 }
 0x82b   :  { %2970 = vpow2.f32 %v1141_v26 }
 0x82c   :  { %2972 = vpow2.f32 %v1139_v1 }
 0x82d   :  { %v3711_v15 = vpop.eup %2966 }
 0x82e   :  { %v3713_v17 = vpop.eup %2968  ;;  %v1174_v36 = vsel %vm58_vm0, %v3711_v15, 0.0  ;;  %v1092_v7 = vpop.xlane.xlu0 %1091 }
 0x82f   :  { %v1089_v34 = vpop.xlane.xlu1 %1088  ;;  %1175 = vadd.xlane.f32.xlu0 %v1174_v36  ;;  %v1171_v4 = vsel %vm58_vm0, %v3713_v17, 0.0  ;;  %v1120_v30 = vsub.f32 %v3581_v37, %v1092_v7 }
 0x830   :  { %v1119_v11 = vsub.f32 %v3583_v38, %v1089_v34  ;;  %1172 = vadd.xlane.f32.xlu1 %v1171_v4 }
 0x831   :  { %v1145_v16 = vmul.f32 1.442695, %v1120_v30 }
 0x832   :  { %v1143_v35 = vmul.f32 1.442695, %v1119_v11 }
 0x834   :  { %2974 = vpow2.f32 %v1143_v35 }
 0x835   :  { %v3720_v39 = vpop.eup %2970 }
 0x836   :  { %v1180_v10 = vsel %vm58_vm0, %v3720_v39, 0.0  ;;  %v3724_v43 = vpop.eup %2972  ;;  %v3730_v49 = vpop.xlane.xlu0 %1097 }
 0x837   :  { %1181 = vadd.xlane.f32.xlu0 %v1180_v10  ;;  %v1177_v45 = vsel %vm58_vm0, %v3724_v43, 0.0  ;;  %v3732_v38 = vpop.xlane.xlu1 %1094 }
 0x83b   :  { %1178 = vadd.xlane.f32.xlu0 %v1177_v45 }
 0x83e   :  { %v3728_v48 = vpop.eup %2974  ;;  %v3736_v51 = vpop.xlane.xlu0 %1103 }
 0x83f   :  { %v1183_v25 = vsel %vm58_vm0, %v3728_v48, 0.0  ;;  %v3738_v55 = vpop.xlane.xlu1 %1100 }
 0x840   :  { %1184 = vadd.xlane.f32.xlu0 %v1183_v25 }
 0x846   :  { %v3740_v0 = vpop.xlane.xlu0 %1109 }
 0x847   :  { %v1126_v58 = vsub.f32 %v3605_v46, %v3740_v0  ;;  %v3744_v59 = vpop.xlane.xlu1 %1106 }
 0x848   :  { %v1125_v29 = vsub.f32 %v3607_v47, %v3744_v59 }
 0x84b   :  { %v1646_v62 = vpop.xlane.xlu1 %1645  ;;  %v1643_v63 = vpop.xlane.xlu0 %1642 }
 0x84c   :  { %v1690_v14 = vsub.f32 %v3613_v50, %v1646_v62  ;;  %v1689_v32 = vsub.f32 %v3615_v23, %v1643_v63 }
 0x84e   :  { %v1707_v20 = vmul.f32 1.442695, %v1690_v14  ;;  %v1705_v33 = vmul.f32 1.442695, %v1689_v32 }
 0x84f   :  { %v1649_v21 = vpop.xlane.xlu1 %1648  ;;  %v1652_v26 = vpop.xlane.xlu0 %1651 }
 0x850   :  { %2976 = vpow2.f32 %v1707_v20  ;;  %v1691_v1 = vsub.f32 %v3623_v53, %v1649_v21  ;;  %v1692_v36 = vsub.f32 %v3621_v52, %v1652_v26 }
 0x851   :  { %2978 = vpow2.f32 %v1705_v33  ;;  %v1121_v33 = vsub.f32 %v3591_v41, %v3732_v38 }
 0x852   :  { %2980 = vpow2.f32 %v1145_v16  ;;  %v1709_v34 = vmul.f32 1.442695, %v1691_v1  ;;  %v1711_v37 = vmul.f32 1.442695, %v1692_v36 }
 0x853   :  { %v1655_v4 = vpop.xlane.xlu1 %1654  ;;  %v1658_v11 = vpop.xlane.xlu0 %1657  ;;  %v1147_v41 = vmul.f32 1.442695, %v1121_v33 }
 0x854   :  { %2982 = vpow2.f32 %v1709_v34  ;;  %v1693_v50 = vsub.f32 %v3631_v57, %v1655_v4  ;;  %v1694_v23 = vsub.f32 %v3629_v56, %v1658_v11  ;;  %v1122_v34 = vsub.f32 %v3589_v40, %v3730_v49 }
 0x855   :  { %2984 = vpow2.f32 %v1711_v37 }
 0x856   :  { %v1713_v35 = vmul.f32 1.442695, %v1693_v50  ;;  %v1715_v10 = vmul.f32 1.442695, %v1694_v23  ;;  %v1149_v50 = vmul.f32 1.442695, %v1122_v34  ;;  %v1123_v23 = vsub.f32 %v3599_v9, %v3738_v55 }
 0x857   :  { %v1661_v7 = vpop.xlane.xlu1 %1660  ;;  %v1664_v45 = vpop.xlane.xlu0 %1663 }
 0x858   :  { %2986 = vpow2.f32 %v1713_v35  ;;  %v1695_v53 = vsub.f32 %v3639_v61, %v1661_v7  ;;  %v1696_v52 = vsub.f32 %v3637_v60, %v1664_v45  ;;  %v1124_v45 = vsub.f32 %v3597_v44, %v3736_v51 }
 0x859   :  { %2988 = vpow2.f32 %v1715_v10 }
 0x85a   :  { %v3757_v25 = vpop.eup %2976  ;;  %v1717_v30 = vmul.f32 1.442695, %v1695_v53  ;;  %v1719_v62 = vmul.f32 1.442695, %v1696_v52  ;;  %v1151_v53 = vmul.f32 1.442695, %v1123_v23 }
 0x85b   :  { %v3759_v63 = vpop.eup %2978  ;;  %v1667_v57 = vpop.xlane.xlu1 %1666  ;;  %v1740_v56 = vsel %vm58_vm0, %v3757_v25, 0.0 }
 0x85c   :  { %v1670_v14 = vpop.xlane.xlu0 %1669  ;;  %v3763_v32 = vpop.eup %2980  ;;  %2990 = vpow2.f32 %v1717_v30  ;;  %v1697_v16 = vsub.f32 %v3647_v3, %v1667_v57  ;;  %1741 = vadd.xlane.f32.xlu0 %v1740_v56  ;;  %v1737_v60 = vsel %vm58_vm0, %v3759_v63, 0.0 }
 0x85d   :  { %v1698_v61 = vsub.f32 %v3645_v2, %v1670_v14  ;;  %1738 = vadd.xlane.f32.xlu1 %v1737_v60  ;;  %2992 = vpow2.f32 %v1719_v62  ;;  %v1186_v1 = vsel %vm58_vm0, %v3763_v32, 0.0  ;;  %v1153_v62 = vmul.f32 1.442695, %v1124_v45 }
 0x85e   :  { %v3769_v20 = vpop.eup %2982  ;;  %v1721_v21 = vmul.f32 1.442695, %v1697_v16 }
 0x85f   :  { %v1723_v26 = vmul.f32 1.442695, %v1698_v61  ;;  %v1743_v3 = vsel %vm58_vm0, %v3769_v20, 0.0  ;;  %v3777_v2 = vpop.eup %2984  ;;  %v1673_v52 = vpop.xlane.xlu1 %1672 }
 0x860   :  { %2994 = vpow2.f32 %v1721_v21  ;;  %1187 = vadd.xlane.f32.xlu0 %v1186_v1  ;;  %v1746_v37 = vsel %vm58_vm0, %v3777_v2, 0.0  ;;  %v1676_v10 = vpop.xlane.xlu0 %1675  ;;  %v1699_v57 = vsub.f32 %v3655_v13, %v1673_v52 }
 0x861   :  { %1744 = vadd.xlane.f32.xlu1 %v1743_v3  ;;  %2996 = vpow2.f32 %v1723_v26 }
 0x862   :  { %v3779_v36 = vpop.eup %2986  ;;  %2998 = vpow2.f32 %v1147_v41  ;;  %v1725_v56 = vmul.f32 1.442695, %v1699_v57  ;;  %v1157_v57 = vmul.f32 1.442695, %v1126_v58 }
 0x863   :  { %v1749_v38 = vsel %vm58_vm0, %v3779_v36, 0.0  ;;  %v3787_v4 = vpop.eup %2988  ;;  %3000 = vpow2.f32 %v1149_v50  ;;  %v1679_v61 = vpop.xlane.xlu1 %1678 }
 0x864   :  { %1747 = vadd.xlane.f32.xlu0 %v1746_v37  ;;  %v1752_v49 = vsel %vm58_vm0, %v3787_v4, 0.0  ;;  %3002 = vpow2.f32 %v1151_v53  ;;  %v1682_v14 = vpop.xlane.xlu0 %1681  ;;  %v1701_v13 = vsub.f32 %v3663_v19, %v1679_v61 }
 0x865   :  { %1750 = vadd.xlane.f32.xlu1 %v1749_v38  ;;  %3004 = vpow2.f32 %v1153_v62  ;;  %v1702_v16 = vsub.f32 %v3661_v18, %v1682_v14  ;;  %v487_v38 = vld [vmem:[%s4259_s4 + $0x58] sm:$0xff]  ;;  %s3102_s4 = scalar_lea.vmem %s2274_s23, 4096 }
 0x866   :  { %v3789_v11 = vpop.eup %2990  ;;  %3006 = vpow2.f32 %v1725_v56  ;;  %v1729_v34 = vmul.f32 1.442695, %v1701_v13  ;;  %p3103_p0 = scmp.ne.s32.totalorder %s2274_s23, %s3102_s4  ;;  %p3108_p2 = scmp.lt.s32.totalorder %s3102_s4, %s3102_s4 }
 0x867   :  { %v1755_v40 = vsel %vm58_vm0, %v3789_v11, 0.0  ;;  %v3797_v35 = vpop.eup %2992  ;;  %v1731_v21 = vmul.f32 1.442695, %v1702_v16  ;;  %v541_v14 = vpop.permute.xlu1 %540 }
 0x868   :  { %1753 = vadd.xlane.f32.xlu0 %v1752_v49  ;;  %v1758_v55 = vsel %vm58_vm0, %v3797_v35, 0.0  ;;  %v1688_v26 = vpop.xlane.xlu0 %1687  ;;  %p3109_p3 = por %p3108_p2, %p3107_p1 }
 0x869   :  { %1756 = vadd.xlane.f32.xlu1 %v1755_v40  ;;  %3008 = vpow2.f32 %v1731_v21  ;;  %v1704_v18 = vsub.f32 %v3669_v22, %v1688_v26 }
 0x86a   :  { %v3799_v7 = vpop.eup %2994  ;;  %3010 = vpow2.f32 %v1729_v34  ;;  %p3110_p4 = pnand %p3109_p3, %p3103_p0 }
 0x86b   :  { %v1761_v9 = vsel %vm58_vm0, %v3799_v7, 0.0  ;;  %v3807_v30 = vpop.eup %2996  ;;  %v1735_v37 = vmul.f32 1.442695, %v1704_v18 }
 0x86c   :  { %1759 = vadd.xlane.f32.xlu0 %v1758_v55  ;;  %v1764_v44 = vsel %vm58_vm0, %v3807_v30, 0.0  ;;  %v3812_v51 = vpop.eup %2998 }
 0x86d   :  { %1762 = vadd.xlane.f32.xlu1 %v1761_v9  ;;  %v1189_v60 = vsel %vm58_vm0, %v3812_v51, 0.0  ;;  %v3817_v33 = vpop.eup %3000  ;;  %3012 = vpow2.f32 %v1735_v37  ;;  %v1700_v9 = vsub.f32 %v3653_v12, %v1676_v10  ;;  %v1155_v12 = vmul.f32 1.442695, %v1125_v29 }
 0x86e   :  { %v1192_v1 = vsel %vm58_vm0, %v3817_v33, 0.0  ;;  %v3822_v3 = vpop.eup %3002 }
 0x86f   :  { %v1195_v41 = vsel %vm58_vm0, %v3822_v3, 0.0  ;;  %v3830_v19 = vpop.eup %3004  ;;  %v1727_v62 = vmul.f32 1.442695, %v1700_v9  ;;  %v536_v58 = vpop.permute.xlu0 %535 }
 0x870   :  { %1765 = vadd.xlane.f32.xlu0 %v1764_v44  ;;  %v1198_v50 = vsel %vm58_vm0, %v3830_v19, 0.0  ;;  %v3834_v23 = vpop.eup %3006  ;;  %v3875_v26 = vadd.f32 %v3500_v42, %v536_v58 }
 0x871   :  { %v1767_v22 = vsel %vm58_vm0, %v3834_v23, 0.0  ;;  %3014 = vpow2.f32 %v1727_v62 }
 0x872   :  { %3016 = vpow2.f32 %v1157_v57 }
 0x873   :  { %v3838_v40 = vpop.eup %3008 }
 0x874   :  { %1190 = vadd.xlane.f32.xlu0 %v1189_v60  ;;  %v1776_v49 = vsel %vm58_vm0, %v3838_v40, 0.0  ;;  %v3842_v45 = vpop.eup %3010 }
 0x875   :  { %v1773_v53 = vsel %vm58_vm0, %v3842_v45, 0.0 }
 0x877   :  { %v3846_v52 = vpop.eup %3012 }
 0x878   :  { %1193 = vadd.xlane.f32.xlu0 %v1192_v1  ;;  %v1782_v55 = vsel %vm58_vm0, %v3846_v52, 0.0 }
 0x87b   :  { %v3858_v16 = vpop.eup %3014 }
 0x87c   :  { %1196 = vadd.xlane.f32.xlu0 %v1195_v41  ;;  %v1770_v61 = vsel %vm58_vm0, %v3858_v16, 0.0  ;;  %v3862_v46 = vpop.eup %3016 }
 0x87d   :  { %v1204_v0 = vsel %vm58_vm0, %v3862_v46, 0.0 }
 0x87e   :  { %545 = vperm.xlu1 %2929, %v487_v38   ;;  %v3881_v38 = vadd.f32 %v3680_v5, %v541_v14  ;;  %v2112_v5 = vld [vmem:[%s4261_s6] sm:$0xff] }
 0x880   :  { %1199 = vadd.xlane.f32.xlu0 %v1198_v50 }
 0x884   :  { %1768 = vadd.xlane.f32.xlu0 %v1767_v22 }
 0x888   :  { %1777 = vadd.xlane.f32.xlu0 %v1776_v49 }
 0x88c   :  { %1774 = vadd.xlane.f32.xlu0 %v1773_v53  ;;  %v2114_v53 = vld [vmem:[%s4261_s6 + $0x10] sm:$0xff] }
 0x890   :  { %1783 = vadd.xlane.f32.xlu0 %v1782_v55 }
 0x898   :  { %v1685_v44 = vpop.xlane.xlu1 %1684 }
 0x899   :  { %v1703_v56 = vsub.f32 %v3673_v28, %v1685_v44 }
 0x89b   :  { %v1733_v10 = vmul.f32 1.442695, %v1703_v56 }
 0x89d   :  { %3018 = vpow2.f32 %v1733_v10 }
 0x89e   :  { %3020 = vpow2.f32 %v1155_v12 }
 0x8a2   :  { %1771 = vadd.xlane.f32.xlu1 %v1770_v61 }
 0x8a6   :  { %1205 = vadd.xlane.f32.xlu1 %v1204_v0 }
 0x8a7   :  { %v3866_v28 = vpop.eup %3018 }
 0x8a8   :  { %v1779_v47 = vsel %vm58_vm0, %v3866_v28, 0.0  ;;  %v3870_v59 = vpop.eup %3020 }
 0x8a9   :  { %1780 = vadd.xlane.f32.xlu0 %v1779_v47  ;;  %v1201_v60 = vsel %vm58_vm0, %v3870_v59, 0.0 }
 0x8ac   :  { %v1164_v29 = vpop.xlane.xlu0 %1163 }
 0x8ad   :  { %3022 = vrcp.f32 %v1164_v29  ;;  %v1161_v13 = vpop.xlane.xlu1 %1160  ;;  %1202 = vadd.xlane.f32.xlu0 %v1201_v60 }
 0x8ae   :  { %3024 = vrcp.f32 %v1161_v13 }
 0x8b4   :  { %v1170_v21 = vpop.xlane.xlu0 %1169 }
 0x8b5   :  { %3026 = vrcp.f32 %v1170_v21  ;;  %v1167_v1 = vpop.xlane.xlu1 %1166 }
 0x8b6   :  { %3028 = vrcp.f32 %v1167_v1 }
 0x8b7   :  { %v3023_v34 = vpop.eup %3022  ;;  %1836 = vrot.lane.b32.xlu1 %v3875_v26, %s3134_s8 }
 0x8b8   :  { %v3025_v18 = vpop.eup %3024  ;;  %v1210_v41 = vmul.f32 %v3023_v34, %v3691_v54 }
 0x8b9   :  { %v1208_v37 = vmul.f32 %v3025_v18, %v3693_v27 }
 0x8ba   :  { %1240 = vst.msk [vmem:[#allocation2 + $0x8] sm:$0xff] %vm58_vm0, %v1210_v41 }
 0x8bb   :  { %1838 = vrot.lane.b32.xlu1 %v3881_v38, %s3134_s8  ;;  %1239 = vst.msk [vmem:[#allocation2] sm:$0xff] %vm58_vm0, %v1208_v37  ;;  %v2772_v50 = vpack.c.bf16 %v1210_v41, %v1208_v37 }
 0x8bc   :  { %v1176_v54 = vpop.xlane.xlu0 %1175 }
 0x8bd   :  { %3030 = vrcp.f32 %v1176_v54  ;;  %v1173_v27 = vpop.xlane.xlu1 %1172  ;;  %2774 = vmatprep.subr.msk.bf16.mxu1 %vm3887_vm5, %v2772_v50 }
 0x8be   :  { %3032 = vrcp.f32 %v1173_v27  ;;  %2777 = vmatpush3.bf16.xpose.msk.msra.mxu1 %vm3887_vm5, %v2772_v50 }
 0x8bf   :  { %v3027_v22 = vpop.eup %3026  ;;  %2118 = vperm.xlu1 %2929, %v2112_v5  }
 0x8c0   :  { %v3029_v49 = vpop.eup %3028  ;;  %v1214_v9 = vmul.f32 %v3027_v22, %v3701_v6 }
 0x8c1   :  { %v1212_v55 = vmul.f32 %v3029_v49, %v3703_v8 }
 0x8c2   :  { %1242 = vst.msk [vmem:[#allocation2 + $0x18] sm:$0xff] %vm58_vm0, %v1214_v9 }
 0x8c3   :  { %2128 = vperm.xlu1 %2929, %v2114_v53   ;;  %1834 = vrot.lane.b32.xlu0 %v3543_v24, %s3134_s8  ;;  %1241 = vst.msk [vmem:[#allocation2 + $0x10] sm:$0xff] %vm58_vm0, %v1212_v55  ;;  %v2778_v62 = vpack.c.bf16 %v1214_v9, %v1212_v55 }
 0x8c4   :  { %v1182_v57 = vpop.xlane.xlu0 %1181 }
 0x8c5   :  { %3034 = vrcp.f32 %v1182_v57  ;;  %2780 = vmatprep.subr.msk.bf16.mxu1 %vm3887_vm5, %v2778_v62 }
 0x8c6   :  { %2783 = vmatpush3.bf16.xpose.msk.msra.mxu1 %vm3887_vm5, %v2778_v62 }
 0x8c7   :  { %v3031_v6 = vpop.eup %3030 }
 0x8c8   :  { %v3033_v14 = vpop.eup %3032  ;;  %v1179_v8 = vpop.xlane.xlu0 %1178  ;;  %v1218_v44 = vmul.f32 %v3031_v6, %v3711_v15 }
 0x8c9   :  { %3036 = vrcp.f32 %v1179_v8  ;;  %v1216_v56 = vmul.f32 %v3033_v14, %v3713_v17 }
 0x8ca   :  { %1244 = vst.msk [vmem:[#allocation2 + $0x28] sm:$0xff] %vm58_vm0, %v1218_v44 }
 0x8cb   :  { %1243 = vst.msk [vmem:[#allocation2 + $0x20] sm:$0xff] %vm58_vm0, %v1216_v56  ;;  %v2784_v24 = vpack.c.bf16 %v1218_v44, %v1216_v56 }
 0x8cd   :  { %2786 = vmatprep.subr.msk.bf16.mxu1 %vm3887_vm5, %v2784_v24  ;;  %v1185_v12 = vpop.xlane.xlu0 %1184 }
 0x8ce   :  { %3038 = vrcp.f32 %v1185_v12  ;;  %2789 = vmatpush3.bf16.xpose.msk.msra.mxu1 %vm3887_vm5, %v2784_v24 }
 0x8cf   :  { %v3035_v10 = vpop.eup %3034 }
 0x8d0   :  { %v1222_v61 = vmul.f32 %v3035_v10, %v3720_v39 }
 0x8d2   :  { %1246 = vst.msk [vmem:[#allocation2 + $0x38] sm:$0xff] %vm58_vm0, %v1222_v61 }
 0x8d3   :  { %v3037_v15 = vpop.eup %3036 }
 0x8d4   :  { %v1220_v17 = vmul.f32 %v3037_v15, %v3724_v43 }
 0x8d6   :  { %1245 = vst.msk [vmem:[#allocation2 + $0x30] sm:$0xff] %vm58_vm0, %v1220_v17  ;;  %v2790_v0 = vpack.c.bf16 %v1222_v61, %v1220_v17 }
 0x8d8   :  { %v3039_v58 = vpop.eup %3038  ;;  %2792 = vmatprep.subr.msk.bf16.mxu1 %vm3887_vm5, %v2790_v0 }
 0x8d9   :  { %2795 = vmatpush3.bf16.xpose.msk.msra.mxu1 %vm3887_vm5, %v2790_v0  ;;  %v1224_v47 = vmul.f32 %v3039_v58, %v3728_v48 }
 0x8db   :  { %1247 = vst.msk [vmem:[#allocation2 + $0x40] sm:$0xff] %vm58_vm0, %v1224_v47 }
 0x8e9   :  { %v1742_v39 = vpop.xlane.xlu0 %1741 }
 0x8ea   :  { %v1739_v29 = vpop.xlane.xlu1 %1738  ;;  %3040 = vrcp.f32 %v1742_v39 }
 0x8eb   :  { %3042 = vrcp.f32 %v1739_v29 }
 0x8ed   :  { %v1188_v60 = vpop.xlane.xlu0 %1187 }
 0x8ee   :  { %v1745_v43 = vpop.xlane.xlu1 %1744  ;;  %3044 = vrcp.f32 %v1188_v60 }
 0x8ef   :  { %3046 = vrcp.f32 %v1745_v43 }
 0x8f1   :  { %v1748_v13 = vpop.xlane.xlu0 %1747 }
 0x8f2   :  { %v1751_v21 = vpop.xlane.xlu1 %1750  ;;  %3048 = vrcp.f32 %v1748_v13 }
 0x8f3   :  { %3050 = vrcp.f32 %v1751_v21 }
 0x8f4   :  { %v3041_v1 = vpop.eup %3040 }
 0x8f5   :  { %v3043_v34 = vpop.eup %3042  ;;  %v1754_v18 = vpop.xlane.xlu0 %1753  ;;  %v1788_v41 = vmul.f32 %v3041_v1, %v3757_v25 }
 0x8f6   :  { %v1757_v48 = vpop.xlane.xlu1 %1756  ;;  %3052 = vrcp.f32 %v1754_v18  ;;  %v1786_v37 = vmul.f32 %v3043_v34, %v3759_v63 }
 0x8f7   :  { %3054 = vrcp.f32 %v1757_v48  ;;  %1819 = vst.msk [vmem:[#allocation2 + $0x88] sm:$0xff] %vm58_vm0, %v1788_v41 }
 0x8f8   :  { %v3045_v50 = vpop.eup %3044  ;;  %1818 = vst.msk [vmem:[#allocation2 + $0x80] sm:$0xff] %vm58_vm0, %v1786_v37  ;;  %v2828_v54 = vpack.c.bf16 %v1788_v41, %v1786_v37 }
 0x8f9   :  { %v3047_v5 = vpop.eup %3046  ;;  %v1760_v27 = vpop.xlane.xlu0 %1759  ;;  %v1226_v22 = vmul.f32 %v3045_v50, %v3763_v32 }
 0x8fa   :  { %v1763_v49 = vpop.xlane.xlu1 %1762  ;;  %2830 = vmatprep.subr.msk.bf16.mxu0 %vm3887_vm5, %v2828_v54  ;;  %3056 = vrcp.f32 %v1760_v27  ;;  %v1790_v25 = vmul.f32 %v3047_v5, %v3769_v20 }
 0x8fb   :  { %3058 = vrcp.f32 %v1763_v49  ;;  %2833 = vmatpush3.bf16.xpose.msk.msra.mxu0 %vm3887_vm5, %v2828_v54  ;;  %1248 = vst.msk [vmem:[#allocation2 + $0x48] sm:$0xff] %vm58_vm0, %v1226_v22  ;;  %v2796_v63 = vpack.c.bf16 %v1226_v22, %v1224_v47 }
 0x8fc   :  { %v3049_v53 = vpop.eup %3048  ;;  %1820 = vst.msk [vmem:[#allocation2 + $0x90] sm:$0xff] %vm58_vm0, %v1790_v25 }
 0x8fd   :  { %v3051_v9 = vpop.eup %3050  ;;  %2798 = vmatprep.subr.msk.bf16.mxu1 %vm3887_vm5, %v2796_v63  ;;  %v1766_v32 = vpop.xlane.xlu0 %1765  ;;  %v1792_v55 = vmul.f32 %v3049_v53, %v3777_v2 }
 0x8fe   :  { %v546_v62 = vpop.permute.xlu1 %545  ;;  %3060 = vrcp.f32 %v1766_v32  ;;  %2801 = vmatpush3.bf16.xpose.msk.msra.mxu1 %vm3887_vm5, %v2796_v63  ;;  %v1794_v20 = vmul.f32 %v3051_v9, %v3779_v36 }
 0x8ff   :  { %v3951_v57 = vadd.f32 %v3678_v31, %v546_v62  ;;  %1821 = vst.msk [vmem:[#allocation2 + $0x98] sm:$0xff] %vm58_vm0, %v1792_v55  ;;  %v2834_v6 = vpack.c.bf16 %v1792_v55, %v1790_v25  ;;  %v2113_v31 = vld [vmem:[%s4261_s6 + $0x8] sm:$0xff] }
 0x900   :  { %v3053_v14 = vpop.eup %3052  ;;  %1822 = vst.msk [vmem:[#allocation2 + $0xa0] sm:$0xff] %vm58_vm0, %v1794_v20 }
 0x901   :  { %v3055_v8 = vpop.eup %3054  ;;  %1840 = vrot.lane.b32.xlu0 %v3951_v57, %s3134_s8  ;;  %2836 = vmatprep.subr.msk.bf16.mxu0 %vm3887_vm5, %v2834_v6  ;;  %v1191_v2 = vpop.xlane.xlu0 %1190  ;;  %v1796_v44 = vmul.f32 %v3053_v14, %v3787_v4 }
 0x902   :  { %3062 = vrcp.f32 %v1191_v2  ;;  %v1798_v36 = vmul.f32 %v3055_v8, %v3789_v11  ;;  %v2115_v11 = vld [vmem:[%s4261_s6 + $0x18] sm:$0xff]  ;;  %v1992_v2 = vld [vmem:[%s4265_s10 + $0x8] sm:$0xff] }
 0x903   :  { %2839 = vmatpush3.bf16.xpose.msk.msra.mxu0 %vm3887_vm5, %v2834_v6  ;;  %1823 = vst.msk [vmem:[#allocation2 + $0xa8] sm:$0xff] %vm58_vm0, %v1796_v44  ;;  %v2840_v56 = vpack.c.bf16 %v1796_v44, %v1794_v20  ;;  %v2007_v20 = vld [vmem:[%s4265_s10 + $0x80] sm:$0xff]  ;;  %v2009_v44 = vld [vmem:[%s4265_s10 + $0x90] sm:$0xff] }
 0x904   :  { %v3057_v24 = vpop.eup %3056  ;;  %1824 = vst.msk [vmem:[#allocation2 + $0xb0] sm:$0xff] %vm58_vm0, %v1798_v36 }
 0x905   :  { %v3059_v12 = vpop.eup %3058  ;;  %2123 = vperm.xlu0 %2928, %v2113_v31   ;;  %2842 = vmatprep.subr.msk.bf16.mxu0 %vm3887_vm5, %v2840_v56  ;;  %v1194_v4 = vpop.xlane.xlu0 %1193  ;;  %v1800_v10 = vmul.f32 %v3057_v24, %v3797_v35  ;;  %v2010_v31 = vld [vmem:[%s4265_s10 + $0x98] sm:$0xff]  ;;  %v1993_v24 = vld [vmem:[%s4265_s10 + $0x10] sm:$0xff] }
 0x906   :  { %3064 = vrcp.f32 %v1194_v4  ;;  %v1802_v61 = vmul.f32 %v3059_v12, %v3799_v7  ;;  %v1994_v12 = vld [vmem:[%s4265_s10 + $0x18] sm:$0xff] }
 0x907   :  { %1825 = vst.msk [vmem:[#allocation2 + $0xb8] sm:$0xff] %vm58_vm0, %v1800_v10  ;;  %v2846_v58 = vpack.c.bf16 %v1800_v10, %v1798_v36  ;;  %v2011_v10 = vld [vmem:[%s4265_s10 + $0xa0] sm:$0xff]  ;;  %v2882_v42 = vpack.c.bf16 %v1994_v12, %v1993_v24  ;;  %v3093_v24 = vld [vmem:[%s4264_s9 + $0x30] sm:$0xff] }
 0x908   :  { %v3061_v15 = vpop.eup %3060  ;;  %1826 = vst.msk [vmem:[#allocation2 + $0xc0] sm:$0xff] %vm58_vm0, %v1802_v61 }
 0x909   :  { %2133 = vperm.xlu0 %2928, %v2115_v11   ;;  %v1197_v17 = vpop.xlane.xlu0 %1196  ;;  %v1804_v0 = vmul.f32 %v3061_v15, %v3807_v30  ;;  %v2012_v11 = vld [vmem:[%s4265_s10 + $0xa8] sm:$0xff]  ;;  %v1995_v15 = vld [vmem:[%s4265_s10 + $0x20] sm:$0xff] }
 0x90a   :  { %3066 = vrcp.f32 %v1197_v17  ;;  %v1996_v17 = vld [vmem:[%s4265_s10 + $0x28] sm:$0xff] }
 0x90b   :  { %2845 = vmatpush3.bf16.xpose.msk.msra.mxu0 %vm3887_vm5, %v2840_v56  ;;  %1827 = vst.msk [vmem:[#allocation2 + $0xc8] sm:$0xff] %vm58_vm0, %v1804_v0  ;;  %v2852_v60 = vpack.c.bf16 %v1804_v0, %v1802_v61  ;;  %v2880_v56 = vpack.c.bf16 %v2010_v31, %v2009_v44  ;;  %v2884_v61 = vpack.c.bf16 %v2012_v11, %v2011_v10  ;;  %v2013_v0 = vld [vmem:[%s4265_s10 + $0xb0] sm:$0xff]  ;;  %v3091_v44 = vld [vmem:[%s4264_s9 + $0x20] sm:$0xff] }
 0x90c   :  { %v3063_v35 = vpop.eup %3062  ;;  %2848 = vmatprep.subr.msk.bf16.mxu0 %vm3887_vm5, %v2846_v58 }
 0x90d   :  { %v1200_v7 = vpop.xlane.xlu0 %1199  ;;  %v1228_v47 = vmul.f32 %v3063_v35, %v3812_v51 }
 0x90e   :  { %3068 = vrcp.f32 %v1200_v7  ;;  %v1997_v7 = vld [vmem:[%s4265_s10 + $0x30] sm:$0xff] }
 0x90f   :  { %1249 = vst.msk [vmem:[#allocation2 + $0x50] sm:$0xff] %vm58_vm0, %v1228_v47 }
 0x910   :  { %v3065_v39 = vpop.eup %3064 }
 0x911   :  { %v1769_v29 = vpop.xlane.xlu0 %1768  ;;  %v1230_v30 = vmul.f32 %v3065_v39, %v3817_v33  ;;  %v2016_v39 = vld [vmem:[%s4265_s10 + $0xc8] sm:$0xff] }
 0x912   :  { %3070 = vrcp.f32 %v1769_v29 }
 0x913   :  { %2851 = vmatpush3.bf16.xpose.msk.msra.mxu0 %vm3887_vm5, %v2846_v58  ;;  %1250 = vst.msk [vmem:[#allocation2 + $0x58] sm:$0xff] %vm58_vm0, %v1230_v30  ;;  %v2802_v43 = vpack.c.bf16 %v1230_v30, %v1228_v47  ;;  %v2886_v58 = vpack.c.bf16 %v1996_v17, %v1995_v15  ;;  %v1998_v47 = vld [vmem:[%s4265_s10 + $0x38] sm:$0xff] }
 0x914   :  { %v3067_v13 = vpop.eup %3066  ;;  %2854 = vmatprep.subr.msk.bf16.mxu0 %vm3887_vm5, %v2852_v60  ;;  %v2890_v29 = vpack.c.bf16 %v1998_v47, %v1997_v7 }
 0x915   :  { %2804 = vmatprep.subr.msk.bf16.mxu1 %vm3887_vm5, %v2802_v43  ;;  %v1778_v51 = vpop.xlane.xlu0 %1777  ;;  %v1232_v21 = vmul.f32 %v3067_v13, %v3822_v3  ;;  %v2017_v13 = vld [vmem:[%s4265_s10 + $0xd0] sm:$0xff] }
 0x916   :  { %3072 = vrcp.f32 %v1778_v51  ;;  %2807 = vmatpush3.bf16.xpose.msk.msra.mxu1 %vm3887_vm5, %v2802_v43  ;;  %v2000_v43 = vld [vmem:[%s4265_s10 + $0x48] sm:$0xff]  ;;  %v2018_v51 = vld [vmem:[%s4265_s10 + $0xd8] sm:$0xff] }
 0x917   :  { %1251 = vst.msk [vmem:[#allocation2 + $0x60] sm:$0xff] %vm58_vm0, %v1232_v21 }
 0x918   :  { %v3069_v33 = vpop.eup %3068 }
 0x919   :  { %v1775_v1 = vpop.xlane.xlu0 %1774  ;;  %v1234_v34 = vmul.f32 %v3069_v33, %v3830_v19  ;;  %v2896_v33 = vpack.c.bf16 %v2018_v51, %v2017_v13 }
 0x91a   :  { %3074 = vrcp.f32 %v1775_v1  ;;  %v2001_v1 = vld [vmem:[%s4265_s10 + $0x50] sm:$0xff] }
 0x91b   :  { %2857 = vmatpush3.bf16.xpose.msk.msra.mxu0 %vm3887_vm5, %v2852_v60  ;;  %1252 = vst.msk [vmem:[#allocation2 + $0x68] sm:$0xff] %vm58_vm0, %v1234_v34  ;;  %v2808_v18 = vpack.c.bf16 %v1234_v34, %v1232_v21  ;;  %v1999_v60 = vld [vmem:[%s4265_s10 + $0x40] sm:$0xff]  ;;  %v2002_v34 = vld [vmem:[%s4265_s10 + $0x58] sm:$0xff] }
 0x91c   :  { %v3071_v41 = vpop.eup %3070  ;;  %v2894_v21 = vpack.c.bf16 %v2000_v43, %v1999_v60 }
 0x91d   :  { %2810 = vmatprep.subr.msk.bf16.mxu1 %vm3887_vm5, %v2808_v18  ;;  %v1784_v3 = vpop.xlane.xlu0 %1783  ;;  %v1806_v48 = vmul.f32 %v3071_v41, %v3834_v23 }
 0x91e   :  { %3076 = vrcp.f32 %v1784_v3  ;;  %2813 = vmatpush3.bf16.xpose.msk.msra.mxu1 %vm3887_vm5, %v2808_v18  ;;  %v2898_v18 = vpack.c.bf16 %v2002_v34, %v2001_v1  ;;  %v2019_v3 = vld [vmem:[%s4265_s10 + $0xe0] sm:$0xff] }
 0x91f   :  { %1828 = vst.msk [vmem:[#allocation2 + $0xd0] sm:$0xff] %vm58_vm0, %v1806_v48 }
 0x920   :  { %v3073_v19 = vpop.eup %3072 }
 0x921   :  { %v1812_v37 = vmul.f32 %v3073_v19, %v3838_v40 }
 0x923   :  { %1831 = vst.msk [vmem:[#allocation2 + $0xe8] sm:$0xff] %vm58_vm0, %v1812_v37 }
 0x924   :  { %v3075_v50 = vpop.eup %3074 }
 0x925   :  { %v1810_v54 = vmul.f32 %v3075_v50, %v3842_v45  ;;  %v2004_v50 = vld [vmem:[%s4265_s10 + $0x68] sm:$0xff] }
 0x927   :  { %1830 = vst.msk [vmem:[#allocation2 + $0xe0] sm:$0xff] %vm58_vm0, %v1810_v54 }
 0x928   :  { %v3077_v5 = vpop.eup %3076 }
 0x929   :  { %v1816_v27 = vmul.f32 %v3077_v5, %v3846_v52  ;;  %v2864_v52 = vpack.c.bf16 %v1812_v37, %v1810_v54  ;;  %v2003_v37 = vld [vmem:[%s4265_s10 + $0x60] sm:$0xff]  ;;  %v2021_v5 = vld [vmem:[%s4265_s10 + $0xf0] sm:$0xff] }
 0x92a   :  { %v2902_v54 = vpack.c.bf16 %v2004_v50, %v2003_v37 }
 0x92b   :  { %1833 = vst.msk [vmem:[#allocation2 + $0xf8] sm:$0xff] %vm58_vm0, %v1816_v27 }
 0x92f   :  { %v1772_v23 = vpop.xlane.xlu1 %1771 }
 0x930   :  { %3078 = vrcp.f32 %v1772_v23 }
 0x933   :  { %v1206_v22 = vpop.xlane.xlu1 %1205 }
 0x934   :  { %3080 = vrcp.f32 %v1206_v22  ;;  %v2005_v22 = vld [vmem:[%s4265_s10 + $0x70] sm:$0xff] }
 0x936   :  { %v1781_v49 = vpop.xlane.xlu0 %1780 }
 0x937   :  { %3082 = vrcp.f32 %v1781_v49  ;;  %v1837_v4 = vpop.permute.xlu1 %1836  ;;  %v2006_v49 = vld [vmem:[%s4265_s10 + $0x78] sm:$0xff] }
 0x93a   :  { %v3079_v25 = vpop.eup %3078  ;;  %v1203_v40 = vpop.xlane.xlu0 %1202 }
 0x93b   :  { %3084 = vrcp.f32 %v1203_v40  ;;  %v1808_v63 = vmul.f32 %v3079_v25, %v3858_v16  ;;  %v2906_v25 = vpack.c.bf16 %v2006_v49, %v2005_v22 }
 0x93d   :  { %1829 = vst.msk [vmem:[#allocation2 + $0xd8] sm:$0xff] %vm58_vm0, %v1808_v63  ;;  %v2858_v45 = vpack.c.bf16 %v1808_v63, %v1806_v48  ;;  %v2020_v48 = vld [vmem:[%s4265_s10 + $0xe8] sm:$0xff] }
 0x93e   :  { %v3081_v53 = vpop.eup %3080  ;;  %v1835_v9 = vpop.permute.xlu0 %1834  ;;  %v2900_v19 = vpack.c.bf16 %v2020_v48, %v2019_v3 }
 0x93f   :  { %2860 = vmatprep.subr.msk.bf16.mxu0 %vm3887_vm5, %v2858_v45  ;;  %2720 = vmatprep.mubr.msk.f32.mxu0 %vm58_vm0, %v1835_v9  ;;  %v1238_v32 = vmul.f32 %v3081_v53, %v3862_v46  ;;  %v2008_v46 = vld [vmem:[%s4265_s10 + $0x88] sm:$0xff] }
 0x940   :  { %2863 = vmatpush3.bf16.xpose.msk.msra.mxu0 %vm3887_vm5, %v2858_v45  ;;  %v2876_v8 = vpack.c.bf16 %v2008_v46, %v2007_v20  ;;  %v3088_v20 = vld [vmem:[%s4264_s9 + $0x18] sm:$0xff] }
 0x941   :  { %v3083_v55 = vpop.eup %3082  ;;  %2866 = vmatprep.subr.msk.bf16.mxu0 %vm3887_vm5, %v2864_v52  ;;  %1254 = vst.msk [vmem:[#allocation2 + $0x78] sm:$0xff] %vm58_vm0, %v1238_v32 }
 0x942   :  { %v1814_v16 = vmul.f32 %v3083_v55, %v3866_v28 }
 0x944   :  { %1832 = vst.msk [vmem:[#allocation2 + $0xf0] sm:$0xff] %vm58_vm0, %v1814_v16  ;;  %v2870_v14 = vpack.c.bf16 %v1816_v27, %v1814_v16  ;;  %v2022_v27 = vld [vmem:[%s4265_s10 + $0xf8] sm:$0xff]  ;;  %v3087_v16 = vld [vmem:[%s4264_s9] sm:$0xff] }
 0x945   :  { %v3085_v62 = vpop.eup %3084  ;;  %v2904_v23 = vpack.c.bf16 %v2022_v27, %v2021_v5 }
 0x946   :  { %v1236_v6 = vmul.f32 %v3085_v62, %v3870_v59  ;;  %v1991_v59 = vld [vmem:[%s4265_s10] sm:$0xff] }
 0x947   :  { %v2878_v36 = vpack.c.bf16 %v1992_v2, %v1991_v59  ;;  %v3090_v59 = vld [vmem:[%s4264_s9 + $0x28] sm:$0xff] }
 0x948   :  { %2869 = vmatpush3.bf16.xpose.msk.msra.mxu0 %vm3887_vm5, %v2864_v52  ;;  %1253 = vst.msk [vmem:[#allocation2 + $0x70] sm:$0xff] %vm58_vm0, %v1236_v6  ;;  %v2814_v28 = vpack.c.bf16 %v1238_v32, %v1236_v6  ;;  %v3086_v32 = vld [vmem:[%s4264_s9 + $0x8] sm:$0xff]  ;;  %v3089_v6 = vld [vmem:[%s4264_s9 + $0x10] sm:$0xff] }
 0x949   :  { %2872 = vmatprep.subr.msk.bf16.mxu0 %vm3887_vm5, %v2870_v14 }
 0x94a   :  { %2816 = vmatprep.subr.msk.bf16.mxu1 %vm3887_vm5, %v2814_v28 }
 0x94b   :  { %2819 = vmatpush3.bf16.xpose.msk.msra.mxu1 %vm3887_vm5, %v2814_v28 }
 0x94c   :  { %2877 = vmatprep.subr.bf16.mxu1 %v2876_v8 }
 0x950   :  { %2875 = vmatpush3.bf16.xpose.msk.msra.mxu0 %vm3887_vm5, %v2870_v14 }
 0x952   :  { %2651 = vmatmul.mubr.msk.f32.vlgmr.msra.gmra.mrb[12].mxu1 %vm58_vm0, %v3875_v26  ;;  %v2014_v26 = vld [vmem:[%s4265_s10 + $0xb8] sm:$0xff] }
 0x953   :  { %2653 = vmatprep.mubr.msk.f32.mxu1 %vm58_vm0, %v3881_v38  ;;  %2879 = vmatpush3.bf16.msra.mxu1 %v2878_v36  ;;  %v1839_v38 = vpop.permute.xlu1 %1838  ;;  %v2888_v35 = vpack.c.bf16 %v2014_v26, %v2013_v0  ;;  %v3092_v36 = vld [vmem:[%s4264_s9 + $0x38] sm:$0xff] }
 0x954   :  { %2881 = vmatprep.subr.bf16.mxu1 %v2880_v56 }
 0x956   :  { %2654 = vmatmul.mubr.msk.f32.gmra.mrb[14].mxu1 %vm58_vm0, %v3951_v57  ;;  %v2015_v57 = vld [vmem:[%s4265_s10 + $0xc0] sm:$0xff] }
 0x957   :  { %2721 = vmatmul.mubr.msk.f32.vlgmr.msra.gmra.mrb[44].mxu0 %vm58_vm0, %v1837_v4  ;;  %2883 = vmatpush3.bf16.msra.mxu1 %v2882_v42  ;;  %v2892_v30 = vpack.c.bf16 %v2016_v39, %v2015_v57  ;;  %v2108_v4 = vld [vmem:[%s4260_s5] sm:$0xff]  ;;  %v2109_v39 = vld [vmem:[%s4260_s5 + $0x8] sm:$0xff] }
 0x958   :  { %2723 = vmatprep.mubr.msk.f32.mxu0 %vm58_vm0, %v1839_v38  ;;  %2885 = vmatprep.subr.bf16.mxu1 %v2884_v61 }
 0x95b   :  { %2887 = vmatpush3.bf16.msra.mxu1 %v2886_v58 }
 0x95c   :  { %2889 = vmatprep.subr.bf16.mxu1 %v2888_v35 }
 0x95f   :  { %2891 = vmatpush3.bf16.msra.mxu1 %v2890_v29  ;;  %v2110_v29 = vld [vmem:[%s4260_s5 + $0x10] sm:$0xff] }
 0x960   :  { %2893 = vmatprep.subr.bf16.mxu1 %v2892_v30  ;;  %v2111_v30 = vld [vmem:[%s4260_s5 + $0x18] sm:$0xff] }
 0x963   :  { %2895 = vmatpush3.bf16.msra.mxu1 %v2894_v21 }
 0x964   :  { %2897 = vmatprep.subr.bf16.mxu1 %v2896_v33 }
 0x967   :  { %2899 = vmatpush3.bf16.msra.mxu1 %v2898_v18 }
 0x968   :  { %2901 = vmatprep.subr.bf16.mxu1 %v2900_v19 }
 0x96b   :  { %2903 = vmatpush3.bf16.msra.mxu1 %v2902_v54 }
 0x96c   :  { %2905 = vmatprep.subr.bf16.mxu1 %v2904_v23 }
 0x96f   :  { %2907 = vmatpush3.bf16.msra.mxu1 %v2906_v25 }
 0x973   :  { %v1841_v41 = vpop.permute.xlu0 %1840 }
 0x974   :  { %2724 = vmatmul.mubr.msk.f32.gmra.mrb[46].mxu0 %vm58_vm0, %v1841_v41 }
 0x984   :  { %v2124_v60 = vpop.permute.xlu0 %2123 }
 0xa25   :  { %v2652_v40 = vpop.f32.mrb[12].mxu1 }
 0xa26   :  { %v1381_v63 = vpop.f32.mrb[13].mxu1  ;;  %v1985_v14 = vmul.f32 %v3089_v6, %v2652_v40 }
 0xa27   :  { %v1983_v62 = vmul.f32 %v3087_v16, %v1381_v63 }
 0xa29   :  { %v2655_v45 = vpop.f32.mrb[14].mxu1 }
 0xa2a   :  { %v2722_v53 = vpop.f32.mrb[44].mxu0  ;;  %v1391_v9 = vpop.f32.mrb[15].mxu1  ;;  %v1989_v12 = vmul.f32 %v3093_v24, %v2655_v45 }
 0xa2b   :  { %v1964_v52 = vpop.f32.mrb[45].mxu0  ;;  %v1986_v46 = vmul.f32 %v3088_v20, %v2722_v53  ;;  %v1987_v31 = vmul.f32 %v3091_v44, %v1391_v9 }
 0xa2c   :  { %v1984_v55 = vmul.f32 %v3086_v32, %v1964_v52 }
 0xa2e   :  { %2087 = vmatprep.mubr.f32.mxu1 %v1984_v55 }
 0xa2f   :  { %2088 = vmatmul.mubr.f32.vlgmr.msra.gmra.mrb[16].mxu1 %v1983_v62 }
 0xa30   :  { %2092 = vmatprep.mubr.f32.mxu1 %v1986_v46 }
 0xa33   :  { %2093 = vmatmul.mubr.f32.gmra.mrb[18].mxu1 %v1985_v14 }
 0xa47   :  { %v2725_v28 = vpop.f32.mrb[46].mxu0 }
 0xa48   :  { %v1974_v8 = vpop.f32.mrb[47].mxu0  ;;  %v1990_v56 = vmul.f32 %v3092_v36, %v2725_v28 }
 0xa49   :  { %v1988_v2 = vmul.f32 %v3090_v59, %v1974_v8 }
 0xa4b   :  { %2097 = vmatprep.mubr.f32.mxu1 %v1988_v2 }
 0xa4c   :  { %2098 = vmatmul.mubr.f32.gmra.mrb[20].mxu1 %v1987_v31 }
 0xa4d   :  { %2102 = vmatprep.mubr.f32.mxu1 %v1990_v56 }
 0xa50   :  { %2103 = vmatmul.mubr.f32.gmra.mrb[22].mxu1 %v1989_v12 }
 0xa51   :  { %2734 = vmatprep.mubr.msk.f32.mxu1 %vm134_vm1, %v2108_v4 }
 0xb02   :  { %v2526_v10 = vpop.f32.mrb[16].mxu1 }
 0xb03   :  { %v2527_v11 = vpop.f32.mrb[17].mxu1 }
 0xb04   :  { %v2528_v42 = vadd.f32 %v2527_v11, %v2526_v10 }
 0xb06   :  { %v2529_v61 = vpop.f32.mrb[18].mxu1 }
 0xb07   :  { %v2530_v15 = vpop.f32.mrb[19].mxu1 }
 0xb08   :  { %v2531_v17 = vadd.f32 %v2530_v15, %v2529_v61 }
 0xb0a   :  { %v2908_v0 = vpack.c.bf16 %v2531_v17, %v2528_v42 }
 0xb0c   :  { %2909 = vmatprep.subr.bf16.mxu1 %v2908_v0 }
 0xb0d   :  { %2911 = vmatpush3.bf16.msra.mxu1 %v2908_v0 }
 0xb1f   :  { %v2532_v26 = vpop.f32.mrb[20].mxu1 }
 0xb20   :  { %v2533_v38 = vpop.f32.mrb[21].mxu1 }
 0xb21   :  { %v2534_v58 = vadd.f32 %v2533_v38, %v2532_v26 }
 0xb23   :  { %v2535_v35 = vpop.f32.mrb[22].mxu1 }
 0xb24   :  { %v2536_v7 = vpop.f32.mrb[23].mxu1 }
 0xb25   :  { %v2537_v47 = vadd.f32 %v2536_v7, %v2535_v35 }
 0xb27   :  { %v2912_v57 = vpack.c.bf16 %v2537_v47, %v2534_v58 }
 0xb29   :  { %2913 = vmatprep.subr.bf16.mxu1 %v2912_v57 }
 0xb2a   :  { %2915 = vmatpush3.bf16.msra.mxu1 %v2912_v57 }
 0xb2d   :  { %2735 = vmatmul.mubr.msk.f32.vlgmr.msra.gmra.mrb[24].mxu1 %vm134_vm1, %v2109_v39 }
 0xb2e   :  { %2737 = vmatprep.mubr.msk.f32.mxu1 %vm134_vm1, %v2110_v29 }
 0xb31   :  { %2738 = vmatmul.mubr.msk.f32.gmra.mrb[26].mxu1 %vm134_vm1, %v2111_v30 }
 0xb32   :  { %3113 = shalt.err (!%p3110_p4)
}
 0xb33   :  { %s3114_s26 = scalar_lea.hbm %s4267_s12, 4096 }
 0xb34   :  { %p3115_p5 = scmp.ne.s32.totalorder %s4267_s12, %s3114_s26  ;;  %p3118_p6 = scmp.lt.u32.totalorder %s3114_s26, %s4267_s12 }
 0xb36   :  { %p3120_p7 = pnand %p3118_p6, %p3115_p5 }
 0xb38   :  { %3123 = shalt.err (!%p3120_p7)
}
 0xb39   :  { %s3136_s7 = smov 128   ;;  %s3137_s28 = smov 8   ;;  %v2119_v43 = vpop.permute.xlu1 %2118  ;;  %v3094_v1 = vld [vmem:[%s4255_s0 + $0x8] sm:$0xff]  ;;  %v2134_v18 = vpop.permute.xlu0 %2133  ;;  %v3095_v41 = vld [vmem:[%s4255_s0] sm:$0xff]  ;;  %v3096_v5 = vld [vmem:[%s4255_s0 + $0x18] sm:$0xff] }
 0xb3a   :  { %2279 = dma.vmem_to_hbm [thread:$0]  %s2274_s23, 4096, %s4267_s12, [#allocation3], %s3136_s7, %s3136_s7, %s3137_s28  }
 0xb3b   :  { %v3097_v23 = vld [vmem:[%s4255_s0 + $0x10] sm:$0xff]  ;;  %v3098_v25 = vld [vmem:[%s4255_s0 + $0x28] sm:$0xff]  ;;  %v3099_v45 = vld [vmem:[%s4255_s0 + $0x20] sm:$0xff] }
 0xb3c   :  { %v3100_v52 = vld [vmem:[%s4255_s0 + $0x38] sm:$0xff]  ;;  %v3101_v16 = vld [vmem:[%s4255_s0 + $0x30] sm:$0xff] }
 0xb3d   :  { %v2129_v19 = vpop.permute.xlu1 %2128 }
 0xc00   :  { %v2736_v13 = vpop.f32.mrb[24].mxu1 }
 0xc01   :  { %v2220_v51 = vadd.f32 %v2736_v13, %v2124_v60  ;;  %v2214_v21 = vpop.f32.mrb[25].mxu1 }
 0xc02   :  { %v2215_v33 = vadd.f32 %v2214_v21, %v2119_v43 }
 0xc03   :  { %v2234_v34 = vadd.f32 %v3094_v1, %v2220_v51  ;;  %2247 = vrot.lane.b32.xlu0 %v2220_v51, %s3134_s8 }
 0xc04   :  { %v2233_v3 = vadd.f32 %v3095_v41, %v2215_v33  ;;  %v2739_v48 = vpop.f32.mrb[26].mxu1  ;;  %2245 = vrot.lane.b32.xlu1 %v2215_v33, %s3134_s8 }
 0xc05   :  { %2238 = vst.msk [vmem:[%s4266_s11 + $0x8] sm:$0xff] %vm58_vm0, %v2234_v34  ;;  %v2230_v37 = vadd.f32 %v2739_v48, %v2134_v18  ;;  %v2224_v50 = vpop.f32.mrb[27].mxu1 }
 0xc06   :  { %2237 = vst.msk [vmem:[%s4266_s11] sm:$0xff] %vm58_vm0, %v2233_v3  ;;  %v2225_v54 = vadd.f32 %v2224_v50, %v2129_v19 }
 0xc07   :  { %v2236_v27 = vadd.f32 %v3096_v5, %v2230_v37  ;;  %2251 = vrot.lane.b32.xlu0 %v2230_v37, %s3134_s8 }
 0xc08   :  { %v2235_v22 = vadd.f32 %v3097_v23, %v2225_v54  ;;  %2249 = vrot.lane.b32.xlu1 %v2225_v54, %s3134_s8 }
 0xc09   :  { %2240 = vst.msk [vmem:[%s4266_s11 + $0x18] sm:$0xff] %vm58_vm0, %v2236_v27 }
 0xc0a   :  { %2239 = vst.msk [vmem:[%s4266_s11 + $0x10] sm:$0xff] %vm58_vm0, %v2235_v22 }
 0xc75   :  { %v2248_v49 = vpop.permute.xlu0 %2247 }
 0xc76   :  { %v2258_v40 = vadd.f32 %v3098_v25, %v2248_v49  ;;  %v2246_v63 = vpop.permute.xlu1 %2245 }
 0xc77   :  { %v2257_v53 = vadd.f32 %v3099_v45, %v2246_v63 }
 0xc78   :  { %2387 = vst.msk [vmem:[%s4266_s11 + $0x28] sm:$0xff] %vm58_vm0, %v2258_v40 }
 0xc79   :  { %2386 = vst.msk [vmem:[%s4266_s11 + $0x20] sm:$0xff] %vm58_vm0, %v2257_v53  ;;  %v2252_v9 = vpop.permute.xlu0 %2251 }
 0xc7a   :  { %v2260_v32 = vadd.f32 %v3100_v52, %v2252_v9  ;;  %v2250_v55 = vpop.permute.xlu1 %2249 }
 0xc7b   :  { %v2259_v62 = vadd.f32 %v3101_v16, %v2250_v55 }
 0xc7c   :  { %2389 = vst.msk [vmem:[%s4266_s11 + $0x38] sm:$0xff] %vm58_vm0, %v2260_v32 }
 0xc7d   :  { %2388 = vst.msk [vmem:[%s4266_s11 + $0x30] sm:$0xff] %vm58_vm0, %v2259_v62 }
 0xc7e   :  { %3124 = dma.done.wait [#allocation3], 4096  }
 0xc7f   :  { %3125 = vsyncadd [#allocation3], 4294963200 }
 0xc80   :  { %2285 = vsyncpa [#allocation3], 1 }

</bundles_post_ra>
